<compile_context>
chip_gen: v6e
topology: v6e:2x2x1
jax: 0.10.0
libtpu: 0.0.40
codegen_flags: <defaults>
</compile_context>

<pallas_src>
import functools

import jax
import jax.numpy as jnp
from jax import lax
from jax.experimental import pallas as pl
from jax.experimental.pallas import tpu as pltpu


# ---------------------------------------------------------------------------
# Pallas kernel: TB batch elements per grid step, flattened to one row-slab.
# ---------------------------------------------------------------------------
def _cnnvec_kernel(xf_ref, w1_ref, b1_ref, w2_ref, b2_ref, wfc_ref, bfc_ref,
                   out_ref, *, l_pad, lo2, tb, c1, c2):
    rows = tb * l_pad                                   # total slab rows this step

    xf = xf_ref[...]                                    # (rows, E_pad) bf16

    # ---- conv1 (E -> 256, k=3) + ReLU: one fused-tap MXU matmul -------------
    # y[:, k*C1:(k+1)*C1] == xf @ w1[tap k]; tap offsets applied by rotating the f32
    # outputs along the sublane axis (XLU slot, essentially free): row r picks up tap k
    # from row r+k (mod rows).
    y = jnp.dot(xf, w1_ref[...], preferred_element_type=jnp.float32)   # (rows, 3*C1)
    h1 = (b1_ref[...]
          + y[:, :c1]
          + pltpu.roll(y[:, c1:2 * c1], shift=rows - 1, axis=0)
          + pltpu.roll(y[:, 2 * c1:3 * c1], shift=rows - 2, axis=0))
    h1 = jnp.maximum(h1, 0.0).astype(jnp.bfloat16)      # (rows, 256) bf16 for next MXU pass

    # ---- conv2 (256 -> 128, k=3) + ReLU: one fused-tap MXU matmul -----------
    z = jnp.dot(h1, w2_ref[...], preferred_element_type=jnp.float32)   # (rows, 3*C2)
    h2 = (b2_ref[...]
          + z[:, :c2]
          + pltpu.roll(z[:, c2:2 * c2], shift=rows - 1, axis=0)
          + pltpu.roll(z[:, 2 * c2:3 * c2], shift=rows - 2, axis=0))
    h2 = jnp.maximum(h2, 0.0)                           # (rows, 128) f32

    # ---- global max pool over valid rows, batched ---------------------------
    # Mask rows whose in-segment position >= lo2 (= L-4: conv boundary, cross-sequence
    # wraparound from the circular roll, and L padding) to -inf, then reduce each
    # L_pad-aligned segment in one shot (reshape keeps (8,128) tiles intact).
    h2_3d = h2.reshape(tb, l_pad, c2)
    pos = lax.broadcasted_iota(jnp.int32, (tb, l_pad, c2), 1)
    pooled = jnp.max(jnp.where(pos < lo2, h2_3d, -jnp.inf), axis=1)    # (tb, 128)

    # ---- FC (lane-dense, out_dim zero-padded to 128 lanes), one block store --
    out_ref[...] = (jnp.dot(pooled, wfc_ref[...], preferred_element_type=jnp.float32)
                    + bfc_ref[...])


# ---------------------------------------------------------------------------
# Wrapper: padding / re-layout / bf16 casts in plain JAX, then pallas_call.
# ---------------------------------------------------------------------------
def cnnvec_forward(x, params):
    """x: (B, L, E) float32 (same layout the nn.Module takes). Returns (B, output_dim) f32."""
    w1, b1, w2, b2, wfc, bfc = params
    B, L, E = x.shape
    if L < 5:
        raise ValueError("seq_len must be >= 5 for two valid k=3 convolutions")
    C1 = w1.shape[0]          # 256
    C2 = w2.shape[0]          # 128
    out_dim = wfc.shape[0]    # 2

    L_pad = ((L + 7) // 8) * 8            # sublane-align each sequence segment
    E_pad = ((E + 127) // 128) * 128      # lane-align the contraction dim (300 -> 384)
    out_pad = ((out_dim + 127) // 128) * 128   # lane-dense output block
    lo2 = L - 4                           # conv2 output length (valid rows per sequence)

    # Batch tile: target ~1024-row matmul slabs to amortize weight pushes / step overhead.
    tb = min(B, max(1, 1024 // L_pad))
    if B >= 16:                           # keep >= 2 grid steps so both v7x TCs get work
        tb = min(tb, max(8, (B // 2) // 8 * 8))
    if tb < B and tb % 8 != 0:            # multi-step grid -> 8-aligned output block rows
        tb = max(8, (tb // 8) * 8)
    b_pad = -(-B // tb) * tb
    rows = tb * L_pad

    # ---- plain-JAX padding / layout / casts (outside the kernel) -----------
    xf = (jnp.zeros((b_pad, L_pad, E_pad), jnp.bfloat16)
          .at[:B, :L, :E].set(x.astype(jnp.bfloat16))
          .reshape(b_pad * L_pad, E_pad))

    # conv1 weights: (C1, E, 3) -> (3, E_pad, C1) -> fused (E_pad, 3*C1) bf16
    w1k = jnp.zeros((3, E_pad, C1), jnp.float32).at[:, :E, :].set(jnp.transpose(w1, (2, 1, 0)))
    w1f = jnp.transpose(w1k, (1, 0, 2)).reshape(E_pad, 3 * C1).astype(jnp.bfloat16)
    # conv2 weights: (C2, C1, 3) -> fused (C1, 3*C2) bf16
    w2k = jnp.transpose(w2, (2, 1, 0))                              # (3, C1, C2)
    w2f = jnp.transpose(w2k, (1, 0, 2)).reshape(C1, 3 * C2).astype(jnp.bfloat16)
    # fc weights/bias padded to 128 output lanes (f32)
    wfck = jnp.zeros((C2, out_pad), jnp.float32).at[:, :out_dim].set(jnp.transpose(wfc))
    bfck = jnp.zeros((1, out_pad), jnp.float32).at[0, :out_dim].set(bfc)
    b1r = b1.reshape(1, C1)
    b2r = b2.reshape(1, C2)

    kernel = functools.partial(_cnnvec_kernel, l_pad=L_pad, lo2=lo2, tb=tb, c1=C1, c2=C2)

    out = pl.pallas_call(
        kernel,
        out_shape=jax.ShapeDtypeStruct((b_pad, out_pad), jnp.float32),
        grid_spec=pltpu.PrefetchScalarGridSpec(
            num_scalar_prefetch=0,
            grid=(b_pad // tb,),
            in_specs=[
                pl.BlockSpec((rows, E_pad), lambda b: (b, 0)),        # flattened x slab
                pl.BlockSpec((E_pad, 3 * C1), lambda b: (0, 0)),      # conv1 fused taps (bf16)
                pl.BlockSpec((1, C1), lambda b: (0, 0)),              # conv1 bias
                pl.BlockSpec((C1, 3 * C2), lambda b: (0, 0)),         # conv2 fused taps (bf16)
                pl.BlockSpec((1, C2), lambda b: (0, 0)),              # conv2 bias
                pl.BlockSpec((C2, out_pad), lambda b: (0, 0)),        # fc weight (padded, T)
                pl.BlockSpec((1, out_pad), lambda b: (0, 0)),         # fc bias (padded)
            ],
            out_specs=pl.BlockSpec((tb, out_pad), lambda b: (b, 0)),  # lane-dense output block
        ),
        compiler_params=pltpu.CompilerParams(
            dimension_semantics=("parallel",),   # batch axis shardable across TCs
        ),
    )(xf, w1f, b1r, w2f, b2r, wfck, bfck)
    return out[:B, :out_dim]


# ---------------------------------------------------------------------------
# Pure-JAX reference (mirrors the PyTorch module exactly, NCW conv layout)
# ---------------------------------------------------------------------------
def reference_forward(x, params):
    w1, b1, w2, b2, wfc, bfc = params
    xc = jnp.transpose(x, (0, 2, 1))  # (B, E, L) == input_vectors.permute(0, 2, 1)
    h = lax.conv_general_dilated(xc, w1, window_strides=(1,), padding="VALID",
                                 dimension_numbers=("NCH", "OIH", "NCH"))
    h = jax.nn.relu(h + b1[None, :, None])
    h = lax.conv_general_dilated(h, w2, window_strides=(1,), padding="VALID",
                                 dimension_numbers=("NCH", "OIH", "NCH"))
    h = jax.nn.relu(h + b2[None, :, None])
    pooled = jnp.max(h, axis=2)                        # AdaptiveMaxPool1d(1).squeeze(2)
    return pooled @ wfc.T + bfc[None, :]


# ---------------------------------------------------------------------------
# Deterministic parameter construction (PyTorch-style uniform bounds)
# ---------------------------------------------------------------------------
def init_params(key, embedding_dim, output_dim):
    ks = jax.random.split(key, 6)

    def u(k, shape, fan_in):
        bound = 1.0 / jnp.sqrt(fan_in)
        return jax.random.uniform(k, shape, jnp.float32, -bound, bound)

    w1 = u(ks[0], (256, embedding_dim, 3), embedding_dim * 3)   # Conv1d(E, 256, 3)
    b1 = u(ks[1], (256,), embedding_dim * 3)
    w2 = u(ks[2], (128, 256, 3), 256 * 3)                       # Conv1d(256, 128, 3)
    b2 = u(ks[3], (128,), 256 * 3)
    wfc = u(ks[4], (output_dim, 128), 128)                      # Linear(128, output_dim)
    bfc = u(ks[5], (output_dim,), 128)
    return (w1, b1, w2, b2, wfc, bfc)


if __name__ == "__main__":
    EMBED_DIM = 300
    OUTPUT_DIM = 2
    BATCH = 2
    SEQ_LEN = 16

    key = jax.random.PRNGKey(0)
    k_x, k_p = jax.random.split(key)
    x = jax.random.normal(k_x, (BATCH, SEQ_LEN, EMBED_DIM), dtype=jnp.float32)
    params = init_params(k_p, EMBED_DIM, OUTPUT_DIM)

    out = jax.block_until_ready(cnnvec_forward(x, params))
    ref = jax.block_until_ready(reference_forward(x, params))

    assert out.shape == (BATCH, OUTPUT_DIM), out.shape
    # bf16 MXU operands (f32 accumulation) vs the f32 reference -> relaxed tolerance.
    if not jnp.allclose(out, ref, atol=3e-2, rtol=3e-2):
        raise AssertionError(f"mismatch: max err {jnp.max(jnp.abs(out - ref))}")

    print("KERNEL_OK")
</pallas_src>

<mosaic_0001>
module attributes {stable_mosaic.version = 11 : i64} {
  func.func @_cnnvec_kernel(%arg0: i32, %arg1: memref<32x384xbf16, #tpu.memory_space<vmem>>, %arg2: memref<384x768xbf16, #tpu.memory_space<vmem>>, %arg3: memref<1x256xf32, #tpu.memory_space<vmem>>, %arg4: memref<256x384xbf16, #tpu.memory_space<vmem>>, %arg5: memref<1x128xf32, #tpu.memory_space<vmem>>, %arg6: memref<128x128xf32, #tpu.memory_space<vmem>>, %arg7: memref<1x128xf32, #tpu.memory_space<vmem>>, %arg8: memref<2x128xf32, #tpu.memory_space<vmem>>) attributes {dimension_semantics = [#tpu.dimension_semantics<parallel>], iteration_bounds = array<i64: 1>, scalar_prefetch = 0 : i64, scratch_operands = 0 : i64, tpu.core_type = #tpu.core_type<tc>, window_params = [{transform_indices = @transform_0, window_bounds = array<i64: 32, 384>}, {pipeline_mode = #tpu.pipeline_mode<synchronous>, transform_indices = @transform_1, window_bounds = array<i64: 384, 768>}, {pipeline_mode = #tpu.pipeline_mode<synchronous>, transform_indices = @transform_2, window_bounds = array<i64: 1, 256>}, {pipeline_mode = #tpu.pipeline_mode<synchronous>, transform_indices = @transform_3, window_bounds = array<i64: 256, 384>}, {pipeline_mode = #tpu.pipeline_mode<synchronous>, transform_indices = @transform_4, window_bounds = array<i64: 1, 128>}, {pipeline_mode = #tpu.pipeline_mode<synchronous>, transform_indices = @transform_5, window_bounds = array<i64: 128, 128>}, {pipeline_mode = #tpu.pipeline_mode<synchronous>, transform_indices = @transform_6, window_bounds = array<i64: 1, 128>}, {transform_indices = @transform_7, window_bounds = array<i64: 2, 128>}]} {
    %c0 = arith.constant 0 : index
    %c0_0 = arith.constant 0 : index
    %0 = vector.load %arg1[%c0, %c0_0] : memref<32x384xbf16, #tpu.memory_space<vmem>>, vector<32x384xbf16>
    %c0_1 = arith.constant 0 : index
    %c0_2 = arith.constant 0 : index
    %1 = vector.load %arg2[%c0_1, %c0_2] : memref<384x768xbf16, #tpu.memory_space<vmem>>, vector<384x768xbf16>
    %cst = arith.constant dense<0.000000e+00> : vector<32x768xf32>
    %2 = tpu.matmul %0, %1, %cst {dimension_numbers = #tpu.dot_dimension_numbers<[1], [0], [0], [1], [0, 0, 1, 1], [], []>} : vector<32x384xbf16>, vector<384x768xbf16>, vector<32x768xf32> -> vector<32x768xf32>
    %c0_3 = arith.constant 0 : index
    %c0_4 = arith.constant 0 : index
    %3 = vector.load %arg3[%c0_3, %c0_4] : memref<1x256xf32, #tpu.memory_space<vmem>>, vector<1x256xf32>
    %4 = vector.extract_strided_slice %2 {offsets = [0, 0], sizes = [32, 256], strides = [1, 1]} : vector<32x768xf32> to vector<32x256xf32>
    %5 = vector.broadcast %3 : vector<1x256xf32> to vector<32x256xf32>
    %6 = arith.addf %5, %4 : vector<32x256xf32>
    %7 = vector.extract_strided_slice %2 {offsets = [0, 256], sizes = [32, 256], strides = [1, 1]} : vector<32x768xf32> to vector<32x256xf32>
    %c31_i32 = arith.constant 31 : i32
    %8 = tpu.dynamic_rotate %7 by %c31_i32 dim 0 : vector<32x256xf32>, i32 -> vector<32x256xf32>
    %9 = arith.addf %6, %8 : vector<32x256xf32>
    %10 = vector.extract_strided_slice %2 {offsets = [0, 512], sizes = [32, 256], strides = [1, 1]} : vector<32x768xf32> to vector<32x256xf32>
    %c30_i32 = arith.constant 30 : i32
    %11 = tpu.dynamic_rotate %10 by %c30_i32 dim 0 : vector<32x256xf32>, i32 -> vector<32x256xf32>
    %12 = arith.addf %9, %11 : vector<32x256xf32>
    %cst_5 = arith.constant 0.000000e+00 : f32
    %13 = vector.broadcast %cst_5 : f32 to vector<32x256xf32>
    %14 = arith.maximumf %12, %13 : vector<32x256xf32>
    %15 = arith.truncf %14 : vector<32x256xf32> to vector<32x256xbf16>
    %c0_6 = arith.constant 0 : index
    %c0_7 = arith.constant 0 : index
    %16 = vector.load %arg4[%c0_6, %c0_7] : memref<256x384xbf16, #tpu.memory_space<vmem>>, vector<256x384xbf16>
    %cst_8 = arith.constant dense<0.000000e+00> : vector<32x384xf32>
    %17 = tpu.matmul %15, %16, %cst_8 {dimension_numbers = #tpu.dot_dimension_numbers<[1], [0], [0], [1], [0, 0, 1, 1], [], []>} : vector<32x256xbf16>, vector<256x384xbf16>, vector<32x384xf32> -> vector<32x384xf32>
    %c0_9 = arith.constant 0 : index
    %c0_10 = arith.constant 0 : index
    %18 = vector.load %arg5[%c0_9, %c0_10] : memref<1x128xf32, #tpu.memory_space<vmem>>, vector<1x128xf32>
    %19 = vector.extract_strided_slice %17 {offsets = [0, 0], sizes = [32, 128], strides = [1, 1]} : vector<32x384xf32> to vector<32x128xf32>
    %20 = vector.broadcast %18 : vector<1x128xf32> to vector<32x128xf32>
    %21 = arith.addf %20, %19 : vector<32x128xf32>
    %22 = vector.extract_strided_slice %17 {offsets = [0, 128], sizes = [32, 128], strides = [1, 1]} : vector<32x384xf32> to vector<32x128xf32>
    %c31_i32_11 = arith.constant 31 : i32
    %23 = tpu.dynamic_rotate %22 by %c31_i32_11 dim 0 : vector<32x128xf32>, i32 -> vector<32x128xf32>
    %24 = arith.addf %21, %23 : vector<32x128xf32>
    %25 = vector.extract_strided_slice %17 {offsets = [0, 256], sizes = [32, 128], strides = [1, 1]} : vector<32x384xf32> to vector<32x128xf32>
    %c30_i32_12 = arith.constant 30 : i32
    %26 = tpu.dynamic_rotate %25 by %c30_i32_12 dim 0 : vector<32x128xf32>, i32 -> vector<32x128xf32>
    %27 = arith.addf %24, %26 : vector<32x128xf32>
    %cst_13 = arith.constant 0.000000e+00 : f32
    %28 = vector.broadcast %cst_13 : f32 to vector<32x128xf32>
    %29 = arith.maximumf %27, %28 : vector<32x128xf32>
    %30 = vector.shape_cast %29 : vector<32x128xf32> to vector<2x16x128xf32>
    %31 = tpu.iota {dimensions = array<i32: 1>} : vector<2x16x128xi32>
    %c12_i32 = arith.constant 12 : i32
    %32 = vector.broadcast %c12_i32 : i32 to vector<2x16x128xi32>
    %33 = arith.cmpi slt, %31, %32 : vector<2x16x128xi32>
    %cst_14 = arith.constant 0xFF800000 : f32
    %34 = vector.broadcast %cst_14 : f32 to vector<2x16x128xf32>
    %35 = arith.select %33, %30, %34 : vector<2x16x128xi1>, vector<2x16x128xf32>
    %cst_15 = arith.constant dense<0xFF800000> : vector<2x128xf32>
    %36 = vector.multi_reduction <maximumf>, %35, %cst_15 [1] : vector<2x16x128xf32> to vector<2x128xf32>
    %c0_16 = arith.constant 0 : index
    %c0_17 = arith.constant 0 : index
    %37 = vector.load %arg6[%c0_16, %c0_17] : memref<128x128xf32, #tpu.memory_space<vmem>>, vector<128x128xf32>
    %cst_18 = arith.constant dense<0.000000e+00> : vector<2x128xf32>
    %38 = tpu.matmul %36, %37, %cst_18 {dimension_numbers = #tpu.dot_dimension_numbers<[1], [0], [0], [1], [0, 0, 1, 1], [], []>} : vector<2x128xf32>, vector<128x128xf32>, vector<2x128xf32> -> vector<2x128xf32>
    %c0_19 = arith.constant 0 : index
    %c0_20 = arith.constant 0 : index
    %39 = vector.load %arg7[%c0_19, %c0_20] : memref<1x128xf32, #tpu.memory_space<vmem>>, vector<1x128xf32>
    %40 = vector.broadcast %39 : vector<1x128xf32> to vector<2x128xf32>
    %41 = arith.addf %38, %40 : vector<2x128xf32>
    %c0_21 = arith.constant 0 : index
    %c0_22 = arith.constant 0 : index
    %42 = vector.load %arg8[%c0_21, %c0_22] : memref<2x128xf32, #tpu.memory_space<vmem>>, vector<2x128xf32>
    tpu.vector_store %arg8[%c0_21, %c0_22], %41 {strides = array<i32>} : memref<2x128xf32, #tpu.memory_space<vmem>>, vector<2x128xf32>,
    return
  }
  func.func @transform_0(%arg0: i32) -> (i32, i32) {
    %c0_i32 = arith.constant 0 : i32
    %c0_i32_0 = arith.constant 0 : i32
    return %arg0, %c0_i32 : i32, i32
  }
  func.func @transform_1(%arg0: i32) -> (i32, i32) {
    %c0_i32 = arith.constant 0 : i32
    %c0_i32_0 = arith.constant 0 : i32
    %c0_i32_1 = arith.constant 0 : i32
    return %c0_i32, %c0_i32_0 : i32, i32
  }
  func.func @transform_2(%arg0: i32) -> (i32, i32) {
    %c0_i32 = arith.constant 0 : i32
    %c0_i32_0 = arith.constant 0 : i32
    %c0_i32_1 = arith.constant 0 : i32
    return %c0_i32, %c0_i32_0 : i32, i32
  }
  func.func @transform_3(%arg0: i32) -> (i32, i32) {
    %c0_i32 = arith.constant 0 : i32
    %c0_i32_0 = arith.constant 0 : i32
    %c0_i32_1 = arith.constant 0 : i32
    return %c0_i32, %c0_i32_0 : i32, i32
  }
  func.func @transform_4(%arg0: i32) -> (i32, i32) {
    %c0_i32 = arith.constant 0 : i32
    %c0_i32_0 = arith.constant 0 : i32
    %c0_i32_1 = arith.constant 0 : i32
    return %c0_i32, %c0_i32_0 : i32, i32
  }
  func.func @transform_5(%arg0: i32) -> (i32, i32) {
    %c0_i32 = arith.constant 0 : i32
    %c0_i32_0 = arith.constant 0 : i32
    %c0_i32_1 = arith.constant 0 : i32
    return %c0_i32, %c0_i32_0 : i32, i32
  }
  func.func @transform_6(%arg0: i32) -> (i32, i32) {
    %c0_i32 = arith.constant 0 : i32
    %c0_i32_0 = arith.constant 0 : i32
    %c0_i32_1 = arith.constant 0 : i32
    return %c0_i32, %c0_i32_0 : i32, i32
  }
  func.func @transform_7(%arg0: i32) -> (i32, i32) {
    %c0_i32 = arith.constant 0 : i32
    %c0_i32_0 = arith.constant 0 : i32
    return %arg0, %c0_i32 : i32, i32
  }
}

</mosaic_0001>

<bundles_post_ra>
// kernel: tpu_custom_call.1
= control target key start
LH: loop header
LB: loop body
LE: loop exit
PB: predicated region body
PF: predicated region fallthrough
CT: control target
= control target key end

     0   :  { %12 = vsyncpa [#allocation3], 0  ;;  %s2869_s0 = inlined_call_operand.hbm [shape: bf16[32,384], index: 0, kind: input, shape index: {}]   ;;  %s2870_s1 = inlined_call_operand.hbm [shape: bf16[384,768], index: 1, kind: input, shape index: {}]   ;;  %s2871_s2 = inlined_call_operand.vmem [shape: f32[1,256], index: 2, kind: input, shape index: {}]   ;;  %s2872_s3 = inlined_call_operand.hbm [shape: bf16[256,384], index: 3, kind: input, shape index: {}]   ;;  %s2873_s4 = inlined_call_operand.vmem [shape: f32[1,128], index: 4, kind: input, shape index: {}]   ;;  %s2874_s5 = inlined_call_operand.hbm [shape: f32[128,128], index: 5, kind: input, shape index: {}]   ;;  %s2875_s6 = inlined_call_operand.vmem [shape: f32[1,128], index: 6, kind: input, shape index: {}]   ;;  %s2876_s7 = inlined_call_operand.hbm [shape: f32[2,128], index: 7, kind: output, shape index: {}]  }
   0x1   :  { %13 = vsyncpa [#allocation6], 0 }
   0x2   :  { %14 = vsyncpa [#allocation9], 0 }
   0x3   :  { %15 = vsyncpa [#allocation4], 0  ;;  %s2677_s24 = smov [#allocation5]  }
   0x4   :  { %s33_s25 = sshll.u32 %s2677_s24, 4  ;;  %s34_s25 = int_to_ptr.vmem [resolvable:$true] %s33_s25 }
   0x5   :  { %s2577_s26 = scalar_lea.vmem %s34_s25, 18432  ;;  %p2582_p1 = scmp.lt.s32.totalorder %s34_s25, %s34_s25 }
   0x6   :  { %p2578_p0 = scmp.ne.s32.totalorder %s34_s25, %s2577_s26  ;;  %p2583_p2 = scmp.lt.s32.totalorder %s2577_s26, %s2577_s26 }
   0x8   :  { %p2584_p3 = por %p2583_p2, %p2582_p1 }
   0xa   :  { %p2585_p4 = pnand %p2584_p3, %p2578_p0 }
   0xc   :  { %2588 = shalt.err (!%p2585_p4)
}
   0xd   :  { %s2678_s27 = smov 384   ;;  %s2679_s28 = smov 24  }
   0xe   :  { %39 = dma.hbm_to_vmem [thread:$0]  %s2870_s1, 18432, %s34_s25, [#allocation6], %s2678_s27, %s2678_s27, %s2679_s28  }
   0xf   :  { %s2680_s8 = smov [#allocation2]  }
  0x10   :  { %s21_s9 = sshll.u32 %s2680_s8, 4  ;;  %s22_s9 = int_to_ptr.vmem [resolvable:$true] %s21_s9 }
  0x11   :  { %s2597_s10 = scalar_lea.vmem %s22_s9, 768  ;;  %p2602_p6 = scmp.lt.s32.totalorder %s22_s9, %s22_s9 }
  0x12   :  { %p2598_p5 = scmp.ne.s32.totalorder %s22_s9, %s2597_s10  ;;  %p2603_p7 = scmp.lt.s32.totalorder %s2597_s10, %s2597_s10 }
  0x14   :  { %p2604_p8 = por %p2603_p7, %p2602_p6 }
  0x16   :  { %p2605_p9 = pnand %p2604_p8, %p2598_p5 }
  0x18   :  { %2608 = shalt.err (!%p2605_p9)
}
  0x19   :  { %s2681_s11 = smov 192   ;;  %s2682_s12 = smov 12  }
  0x1a   :  { %27 = dma.hbm_to_vmem [thread:$0]  %s2869_s0, 768, %s22_s9, [#allocation3], %s2681_s11, %s2681_s11, %s2682_s12  }
  0x1b   :  { %s2683_s15 = smov [#allocation7]   ;;  %s2684_s17 = smov [#allocation8]  }
  0x1c   :  { %s47_s16 = sshll.u32 %s2683_s15, 4  ;;  %s61_s1 = sshll.u32 %s2684_s17, 4  ;;  %s48_s16 = int_to_ptr.vmem [resolvable:$true] %s47_s16  ;;  %s62_s1 = int_to_ptr.vmem [resolvable:$true] %s61_s1 }
  0x1d   :  { %s2617_s18 = scalar_lea.vmem %s48_s16, 6144  ;;  %p2622_p11 = scmp.lt.s32.totalorder %s48_s16, %s48_s16 }
  0x1e   :  { %p2618_p10 = scmp.ne.s32.totalorder %s48_s16, %s2617_s18  ;;  %p2623_p12 = scmp.lt.s32.totalorder %s2617_s18, %s2617_s18 }
  0x20   :  { %p2624_p13 = por %p2623_p12, %p2622_p11 }
  0x22   :  { %p2625_p0 = pnand %p2624_p13, %p2618_p10 }
  0x24   :  { %2628 = shalt.err (!%p2625_p0)
}
  0x25   :  { %53 = dma.hbm_to_vmem [thread:$0]  %s2872_s3, 6144, %s48_s16, [#allocation6], %s2681_s11, %s2681_s11, %s2682_s12  }
  0x26   :  { %s2637_s21 = scalar_lea.vmem %s62_s1, 2048  ;;  %p2642_p2 = scmp.lt.s32.totalorder %s62_s1, %s62_s1 }
  0x27   :  { %p2638_p1 = scmp.ne.s32.totalorder %s62_s1, %s2637_s21  ;;  %p2643_p3 = scmp.lt.s32.totalorder %s2637_s21, %s2637_s21 }
  0x29   :  { %p2644_p4 = por %p2643_p3, %p2642_p2 }
  0x2b   :  { %p2645_p5 = pnand %p2644_p4, %p2638_p1 }
  0x2d   :  { %2648 = shalt.err (!%p2645_p5)
}
  0x2e   :  { %s2685_s0 = smov 128   ;;  %s2686_s22 = smov 8  }
  0x2f   :  { %67 = dma.hbm_to_vmem [thread:$0]  %s2874_s5, 2048, %s62_s1, [#allocation9], %s2685_s0, %s2685_s0, %s2686_s22  }
  0x30   :  { %2669 = dma.done.wait [#allocation3], 768  }
  0x31   :  { %2670 = vsyncadd [#allocation3], 4294966528 }
  0x32   :  { %2671 = dma.done.wait [#allocation6], 24576  }
  0x33   :  { %2672 = vsyncadd [#allocation6], 4294942720 }
  0x34   :  { %2673 = dma.done.wait [#allocation9], 2048  }
  0x35   :  { %2674 = vsyncadd [#allocation9], 4294965248  ;;  %v2687_v0 = vmov 0   ;;  %v2281_v1 = vld [vmem:[#allocation5 + $0x154] ss:$24 sps:$4 sm:$0xff]   ;;  %vm2689_vm2 = vmmov 0  }
  0x36   :  { %1072 = vmatprep.mubr.bf16.mxu1 %v2687_v0  ;;  %v2283_v2 = vld [vmem:[#allocation5 + $0x454] ss:$24 sps:$4 sm:$0xff]   ;;  %987 = vmatprep.subr.bf16.mxu0 %v2281_v1  ;;  %v2285_v3 = vld [vmem:[#allocation5 + $0x150] ss:$24 sps:$4 sm:$0xff]   ;;  %v2287_v5 = vld [vmem:[#allocation5 + $0x124] ss:$24 sps:$4 sm:$0xff]  }
  0x37   :  { %v2286_v4 = vld [vmem:[#allocation5 + $0x450] ss:$24 sps:$4 sm:$0xff]   ;;  %1040 = vmatprep.subr.bf16.mxu1 %v2283_v2  ;;  %988 = vmatpush1.bf16.msra.mxu0 %v2285_v3  ;;  %v2289_v6 = vld [vmem:[#allocation5 + $0x424] ss:$24 sps:$4 sm:$0xff]   ;;  %v2291_v7 = vld [vmem:[#allocation5 + $0x120] ss:$24 sps:$4 sm:$0xff]  }
  0x38   :  { %1041 = vmatpush1.bf16.msra.mxu1 %v2286_v4  ;;  %989 = vmatprep.subr.bf16.mxu0 %v2287_v5  ;;  %v2292_v8 = vld [vmem:[#allocation5 + $0x420] ss:$24 sps:$4 sm:$0xff]   ;;  %v2293_v9 = vld [vmem:[#allocation5 + $0xf4] ss:$24 sps:$4 sm:$0xff]   ;;  %v2297_v11 = vld [vmem:[#allocation5 + $0xf0] ss:$24 sps:$4 sm:$0xff]  }
  0x39   :  { %1042 = vmatprep.subr.bf16.mxu1 %v2289_v6  ;;  %v2295_v10 = vld [vmem:[#allocation5 + $0x3f4] ss:$24 sps:$4 sm:$0xff]   ;;  %v2298_v12 = vld [vmem:[#allocation5 + $0x3f0] ss:$24 sps:$4 sm:$0xff]   ;;  %v2299_v13 = vld [vmem:[#allocation5 + $0xc4] ss:$24 sps:$4 sm:$0xff]  }
  0x3a   :  { %v2301_v14 = vld [vmem:[#allocation5 + $0x3c4] ss:$24 sps:$4 sm:$0xff]   ;;  %v2303_v15 = vld [vmem:[#allocation5 + $0xc0] ss:$24 sps:$4 sm:$0xff]   ;;  %v2305_v17 = vld [vmem:[#allocation5 + $0x94] ss:$24 sps:$4 sm:$0xff]  }
  0x3b   :  { %990 = vmatpush1.bf16.msra.mxu0 %v2291_v7  ;;  %v2304_v16 = vld [vmem:[#allocation5 + $0x3c0] ss:$24 sps:$4 sm:$0xff]   ;;  %v2307_v18 = vld [vmem:[#allocation5 + $0x394] ss:$24 sps:$4 sm:$0xff]   ;;  %v2309_v19 = vld [vmem:[#allocation5 + $0x90] ss:$24 sps:$4 sm:$0xff]  }
  0x3c   :  { %1043 = vmatpush1.bf16.msra.mxu1 %v2292_v8  ;;  %991 = vmatprep.subr.bf16.mxu0 %v2293_v9  ;;  %v2310_v20 = vld [vmem:[#allocation5 + $0x390] ss:$24 sps:$4 sm:$0xff]   ;;  %v2311_v21 = vld [vmem:[#allocation5 + $0x64] ss:$24 sps:$4 sm:$0xff]   ;;  %v2315_v23 = vld [vmem:[#allocation5 + $0x60] ss:$24 sps:$4 sm:$0xff]  }
  0x3d   :  { %1044 = vmatprep.subr.bf16.mxu1 %v2295_v10  ;;  %v2313_v22 = vld [vmem:[#allocation5 + $0x364] ss:$24 sps:$4 sm:$0xff]   ;;  %v2316_v24 = vld [vmem:[#allocation5 + $0x360] ss:$24 sps:$4 sm:$0xff]   ;;  %v2317_v25 = vld [vmem:[#allocation5 + $0x34] ss:$24 sps:$4 sm:$0xff]  }
  0x3e   :  { %v2319_v26 = vld [vmem:[#allocation5 + $0x334] ss:$24 sps:$4 sm:$0xff]   ;;  %v2321_v27 = vld [vmem:[#allocation5 + $0x30] ss:$24 sps:$4 sm:$0xff]   ;;  %v2323_v29 = vld [vmem:[#allocation5 + $0x4] ss:$24 sps:$4 sm:$0xff]  }
  0x3f   :  { %992 = vmatpush1.bf16.msra.mxu0 %v2297_v11  ;;  %v2322_v28 = vld [vmem:[#allocation5 + $0x330] ss:$24 sps:$4 sm:$0xff]   ;;  %v2325_v30 = vld [vmem:[#allocation5 + $0x304] ss:$24 sps:$4 sm:$0xff]   ;;  %v2327_v31 = vld [vmem:[#allocation5] ss:$24 sps:$4 sm:$0xff]  }
  0x40   :  { %1045 = vmatpush1.bf16.msra.mxu1 %v2298_v12  ;;  %993 = vmatprep.subr.bf16.mxu0 %v2299_v13  ;;  %v2328_v32 = vld [vmem:[#allocation5 + $0x300] ss:$24 sps:$4 sm:$0xff]   ;;  %v2329_v33 = vld [vmem:[#allocation5 + $0x2d4] ss:$24 sps:$4 sm:$0xff]   ;;  %v2334_v37 = vld [vmem:[#allocation5 + $0x2d0] ss:$24 sps:$4 sm:$0xff]  }
  0x41   :  { %1046 = vmatprep.subr.bf16.mxu1 %v2301_v14  ;;  %v2333_v34 = vld [vmem:[#allocation5 + $0x15c] ss:$24 sps:$4 sm:$0xff]   ;;  %v2744_v35 = vld [vmem:[#allocation2 + $0x8] ss:$12 sps:$4 sm:$0xff]   ;;  %v2338_v40 = vld [vmem:[#allocation5 + $0x128] ss:$24 sps:$4 sm:$0xff]  }
  0x42   :  { %v2331_v36 = vld [vmem:[#allocation5 + $0x158] ss:$24 sps:$4 sm:$0xff]   ;;  %v2336_v38 = vld [vmem:[#allocation5 + $0x2a4] ss:$24 sps:$4 sm:$0xff]   ;;  %v2342_v42 = vld [vmem:[#allocation5 + $0x274] ss:$24 sps:$4 sm:$0xff]  }
  0x43   :  { %994 = vmatpush1.bf16.msra.mxu0 %v2303_v15  ;;  %v2340_v39 = vld [vmem:[#allocation5 + $0x12c] ss:$24 sps:$4 sm:$0xff]   ;;  %v2341_v41 = vld [vmem:[#allocation5 + $0x2a0] ss:$24 sps:$4 sm:$0xff]   ;;  %v2346_v43 = vld [vmem:[#allocation5 + $0xfc] ss:$24 sps:$4 sm:$0xff]  }
  0x44   :  { %1047 = vmatpush1.bf16.msra.mxu1 %v2304_v16  ;;  %995 = vmatprep.subr.bf16.mxu0 %v2305_v17  ;;  %v2344_v44 = vld [vmem:[#allocation5 + $0xf8] ss:$24 sps:$4 sm:$0xff]   ;;  %v2348_v46 = vld [vmem:[#allocation5 + $0x244] ss:$24 sps:$4 sm:$0xff]   ;;  %v2350_v48 = vld [vmem:[#allocation5 + $0xc8] ss:$24 sps:$4 sm:$0xff]  }
  0x45   :  { %1048 = vmatprep.subr.bf16.mxu1 %v2307_v18  ;;  %v2347_v45 = vld [vmem:[#allocation5 + $0x270] ss:$24 sps:$4 sm:$0xff]   ;;  %v2352_v47 = vld [vmem:[#allocation5 + $0xcc] ss:$24 sps:$4 sm:$0xff]   ;;  %v2353_v49 = vld [vmem:[#allocation5 + $0x240] ss:$24 sps:$4 sm:$0xff]  }
  0x46   :  { %v2354_v50 = vld [vmem:[#allocation5 + $0x214] ss:$24 sps:$4 sm:$0xff]   ;;  %v2356_v53 = vld [vmem:[#allocation5 + $0x98] ss:$24 sps:$4 sm:$0xff]   ;;  %v2360_v55 = vld [vmem:[#allocation5 + $0x1e4] ss:$24 sps:$4 sm:$0xff]  }
  0x47   :  { %996 = vmatpush1.bf16.msra.mxu0 %v2309_v19  ;;  %v2748_v51 = vld [vmem:[#allocation2 + $0x4] ss:$12 sps:$4 sm:$0xff]   ;;  %v2359_v54 = vld [vmem:[#allocation5 + $0x210] ss:$24 sps:$4 sm:$0xff]   ;;  %v2364_v56 = vld [vmem:[#allocation5 + $0x6c] ss:$24 sps:$4 sm:$0xff]  }
  0x48   :  { %1049 = vmatpush1.bf16.msra.mxu1 %v2310_v20  ;;  %997 = vmatprep.subr.bf16.mxu0 %v2311_v21  ;;  %v2358_v52 = vld [vmem:[#allocation5 + $0x9c] ss:$24 sps:$4 sm:$0xff]   ;;  %v2362_v57 = vld [vmem:[#allocation5 + $0x68] ss:$24 sps:$4 sm:$0xff]   ;;  %v2368_v61 = vld [vmem:[#allocation5 + $0x38] ss:$24 sps:$4 sm:$0xff]  }
  0x49   :  { %1050 = vmatprep.subr.bf16.mxu1 %v2313_v22  ;;  %1019 = vmatprep.mubr.bf16.mxu0 %v2748_v51  ;;  %v2365_v58 = vld [vmem:[#allocation5 + $0x1e0] ss:$24 sps:$4 sm:$0xff]   ;;  %v2366_v59 = vld [vmem:[#allocation5 + $0x1b4] ss:$24 sps:$4 sm:$0xff]   ;;  %v2371_v62 = vld [vmem:[#allocation5 + $0x1b0] ss:$24 sps:$4 sm:$0xff]  }
  0x4a   :  { %v2370_v60 = vld [vmem:[#allocation5 + $0x3c] ss:$24 sps:$4 sm:$0xff]   ;;  %v2376_v1 = vld [vmem:[#allocation5 + $0xc] ss:$24 sps:$4 sm:$0xff]   ;;  %v2374_v2 = vld [vmem:[#allocation5 + $0x8] ss:$24 sps:$4 sm:$0xff]  }
  0x4b   :  { %998 = vmatpush1.bf16.msra.mxu0 %v2315_v23  ;;  %v2372_v63 = vld [vmem:[#allocation5 + $0x184] ss:$24 sps:$4 sm:$0xff]   ;;  %v2377_v3 = vld [vmem:[#allocation5 + $0x180] ss:$24 sps:$4 sm:$0xff]   ;;  %v2761_v17 = vld [vmem:[#allocation2 + $0x18] ss:$12 sps:$4 sm:$0xff]  }
  0x4c   :  { %1051 = vmatpush1.bf16.msra.mxu1 %v2316_v24  ;;  %999 = vmatprep.subr.bf16.mxu0 %v2317_v25  ;;  %v2751_v4 = vld [vmem:[#allocation2 + $0x20] ss:$12 sps:$4 sm:$0xff]   ;;  %v2389_v10 = vld [vmem:[#allocation5 + $0x2ac] ss:$24 sps:$4 sm:$0xff]   ;;  %v2387_v13 = vld [vmem:[#allocation5 + $0x2a8] ss:$24 sps:$4 sm:$0xff]  }
  0x4d   :  { %1052 = vmatprep.subr.bf16.mxu1 %v2319_v26  ;;  %v2383_v5 = vld [vmem:[#allocation5 + $0x2dc] ss:$24 sps:$4 sm:$0xff]   ;;  %v2381_v8 = vld [vmem:[#allocation5 + $0x2d8] ss:$24 sps:$4 sm:$0xff]   ;;  %v2392_v11 = vld [vmem:[#allocation5 + $0x42c] ss:$24 sps:$4 sm:$0xff]  }
  0x4e   :  { %v2386_v6 = vld [vmem:[#allocation5 + $0x45c] ss:$24 sps:$4 sm:$0xff]   ;;  %v2384_v9 = vld [vmem:[#allocation5 + $0x458] ss:$24 sps:$4 sm:$0xff]   ;;  %v2390_v14 = vld [vmem:[#allocation5 + $0x428] ss:$24 sps:$4 sm:$0xff]  }
  0x4f   :  { %1000 = vmatpush1.bf16.msra.mxu0 %v2321_v27  ;;  %v2754_v7 = vld [vmem:[#allocation2] ss:$12 sps:$4 sm:$0xff]   ;;  %v2757_v12 = vld [vmem:[#allocation2 + $0x1c] ss:$12 sps:$4 sm:$0xff]   ;;  %v2399_v22 = vld [vmem:[#allocation5 + $0x248] ss:$24 sps:$4 sm:$0xff]  }
  0x50   :  { %1053 = vmatpush1.bf16.msra.mxu1 %v2322_v28  ;;  %1001 = vmatprep.subr.bf16.mxu0 %v2323_v29  ;;  %v2395_v15 = vld [vmem:[#allocation5 + $0x27c] ss:$24 sps:$4 sm:$0xff]   ;;  %v2393_v18 = vld [vmem:[#allocation5 + $0x278] ss:$24 sps:$4 sm:$0xff]   ;;  %v2401_v20 = vld [vmem:[#allocation5 + $0x24c] ss:$24 sps:$4 sm:$0xff]  }
  0x51   :  { %1054 = vmatprep.subr.bf16.mxu1 %v2325_v30  ;;  %v2398_v16 = vld [vmem:[#allocation5 + $0x3fc] ss:$24 sps:$4 sm:$0xff]   ;;  %v2396_v19 = vld [vmem:[#allocation5 + $0x3f8] ss:$24 sps:$4 sm:$0xff]   ;;  %v2404_v21 = vld [vmem:[#allocation5 + $0x3cc] ss:$24 sps:$4 sm:$0xff]  }
  0x52   :  { %v2402_v23 = vld [vmem:[#allocation5 + $0x3c8] ss:$24 sps:$4 sm:$0xff]   ;;  %v2407_v24 = vld [vmem:[#allocation5 + $0x21c] ss:$24 sps:$4 sm:$0xff]   ;;  %v2405_v26 = vld [vmem:[#allocation5 + $0x218] ss:$24 sps:$4 sm:$0xff]  }
  0x53   :  { %1002 = vmatpush1.bf16.msra.mxu0 %v2327_v31  ;;  %v2410_v25 = vld [vmem:[#allocation5 + $0x39c] ss:$24 sps:$4 sm:$0xff]   ;;  %v2408_v27 = vld [vmem:[#allocation5 + $0x398] ss:$24 sps:$4 sm:$0xff]   ;;  %v2417_v28 = vld [vmem:[#allocation5 + $0x1ec] ss:$24 sps:$4 sm:$0xff]  }
  0x54   :  { %1055 = vmatpush1.bf16.msra.mxu1 %v2328_v32  ;;  %1003 = vmatprep.subr.bf16.mxu0 %v2329_v33  ;;  %v2420_v29 = vld [vmem:[#allocation5 + $0x36c] ss:$24 sps:$4 sm:$0xff]   ;;  %v2415_v30 = vld [vmem:[#allocation5 + $0x1e8] ss:$24 sps:$4 sm:$0xff]   ;;  %v2423_v32 = vld [vmem:[#allocation5 + $0x1bc] ss:$24 sps:$4 sm:$0xff]  }
  0x55   :  { %1093 = vmatprep.subr.bf16.mxu1 %v2333_v34  ;;  %v2418_v31 = vld [vmem:[#allocation5 + $0x368] ss:$24 sps:$4 sm:$0xff]   ;;  %v2426_v33 = vld [vmem:[#allocation5 + $0x33c] ss:$24 sps:$4 sm:$0xff]   ;;  %v2421_v34 = vld [vmem:[#allocation5 + $0x1b8] ss:$24 sps:$4 sm:$0xff]  }
  0x56   :  { %vm1896_vm4 = vcmask 1041409   ;;  %s2690_s27 = smov [#allocation10]  }
  0x57   :  { %1073 = vmatmul.mubr.bf16.vlgmr.msra.gmra.mxu1 %v2744_v35  ;;  %1004 = vmatpush2.bf16.msra.mxu0 %v2334_v37  ;;  %v2429_v37 = vld [vmem:[#allocation5 + $0x18c] ss:$24 sps:$4 sm:$0xff]   ;;  %s1976_s28 = sshll.u32 %s2690_s27, 4  ;;  %s1977_s28 = int_to_ptr.vmem [resolvable:$true] %s1976_s28 }
  0x58   :  { %1094 = vmatpush1.bf16.msra.mxu1 %v2331_v36  ;;  %1005 = vmatprep.subr.bf16.mxu0 %v2336_v38  ;;  %v2424_v36 = vld [vmem:[#allocation5 + $0x338] ss:$24 sps:$4 sm:$0xff]   ;;  %v2432_v38 = vld [vmem:[#allocation5 + $0x30c] ss:$24 sps:$4 sm:$0xff]   ;;  %s2649_s29 = scalar_lea.vmem %s1977_s28, 32  ;;  %p2654_p7 = scmp.lt.s32.totalorder %s1977_s28, %s1977_s28 }
  0x59   :  { %1095 = vmatprep.subr.bf16.mxu1 %v2340_v39  ;;  %1082 = vmatprep.mubr.bf16.mxu1 %v2687_v0  ;;  %v2427_v39 = vld [vmem:[#allocation5 + $0x188] ss:$24 sps:$4 sm:$0xff]   ;;  %p2650_p6 = scmp.ne.s32.totalorder %s1977_s28, %s2649_s29  ;;  %p2655_p8 = scmp.lt.s32.totalorder %s2649_s29, %s2649_s29 }
  0x5b   :  { %1006 = vmatpush2.bf16.msra.mxu0 %v2341_v41  ;;  %v2435_v41 = vld [vmem:[#allocation5 + $0x164] ss:$24 sps:$4 sm:$0xff]   ;;  %p2656_p9 = por %p2655_p8, %p2654_p7 }
  0x5c   :  { %1096 = vmatpush1.bf16.msra.mxu1 %v2338_v40  ;;  %1007 = vmatprep.subr.bf16.mxu0 %v2342_v42  ;;  %v2430_v40 = vld [vmem:[#allocation5 + $0x308] ss:$24 sps:$4 sm:$0xff]   ;;  %v2456_v42 = vld [vmem:[#allocation5 + $0x464] ss:$24 sps:$4 sm:$0xff]  }
  0x5d   :  { %1097 = vmatprep.subr.bf16.mxu1 %v2346_v43  ;;  %v2433_v43 = vld [vmem:[#allocation5 + $0x160] ss:$24 sps:$4 sm:$0xff]   ;;  %p2657_p10 = pnand %p2656_p9, %p2650_p6 }
  0x5f   :  { %1008 = vmatpush2.bf16.msra.mxu0 %v2347_v45  ;;  %1083 = vmatmul.mubr.bf16.gmra.mxu1 %v2751_v4  ;;  %v2436_v45 = vld [vmem:[#allocation5 + $0x130] ss:$24 sps:$4 sm:$0xff]  }
  0x60   :  { %1098 = vmatpush1.bf16.msra.mxu1 %v2344_v44  ;;  %1009 = vmatprep.subr.bf16.mxu0 %v2348_v46  ;;  %v2438_v44 = vld [vmem:[#allocation5 + $0x134] ss:$24 sps:$4 sm:$0xff]   ;;  %v2454_v46 = vld [vmem:[#allocation5 + $0x460] ss:$24 sps:$4 sm:$0xff]  }
  0x61   :  { %1099 = vmatprep.subr.bf16.mxu1 %v2352_v47  ;;  %1125 = vmatprep.mubr.bf16.mxu1 %v2748_v51  ;;  %v2462_v47 = vld [vmem:[#allocation5 + $0x434] ss:$24 sps:$4 sm:$0xff]  }
  0x63   :  { %1010 = vmatpush2.bf16.msra.mxu0 %v2353_v49  ;;  %v2460_v49 = vld [vmem:[#allocation5 + $0x430] ss:$24 sps:$4 sm:$0xff]  }
  0x64   :  { %1100 = vmatpush1.bf16.msra.mxu1 %v2350_v48  ;;  %1011 = vmatprep.subr.bf16.mxu0 %v2354_v50  ;;  %v2441_v48 = vld [vmem:[#allocation5 + $0x104] ss:$24 sps:$4 sm:$0xff]   ;;  %v2439_v50 = vld [vmem:[#allocation5 + $0x100] ss:$24 sps:$4 sm:$0xff]  }
  0x65   :  { %1101 = vmatprep.subr.bf16.mxu1 %v2358_v52  ;;  %v2468_v52 = vld [vmem:[#allocation5 + $0x404] ss:$24 sps:$4 sm:$0xff]  }
  0x67   :  { %1012 = vmatpush2.bf16.msra.mxu0 %v2359_v54  ;;  %v2466_v54 = vld [vmem:[#allocation5 + $0x400] ss:$24 sps:$4 sm:$0xff]  }
  0x68   :  { %1102 = vmatpush1.bf16.msra.mxu1 %v2356_v53  ;;  %1013 = vmatprep.subr.bf16.mxu0 %v2360_v55  ;;  %v2444_v53 = vld [vmem:[#allocation5 + $0xd4] ss:$24 sps:$4 sm:$0xff]  }
  0x69   :  { %1103 = vmatprep.subr.bf16.mxu1 %v2364_v56  ;;  %v2474_v55 = vld [vmem:[#allocation5 + $0x3d4] ss:$24 sps:$4 sm:$0xff]   ;;  %v2442_v56 = vld [vmem:[#allocation5 + $0xd0] ss:$24 sps:$4 sm:$0xff]  }
  0x6b   :  { %1014 = vmatpush2.bf16.msra.mxu0 %v2365_v58  ;;  %v2472_v58 = vld [vmem:[#allocation5 + $0x3d0] ss:$24 sps:$4 sm:$0xff]  }
  0x6c   :  { %1104 = vmatpush1.bf16.msra.mxu1 %v2362_v57  ;;  %1015 = vmatprep.subr.bf16.mxu0 %v2366_v59  ;;  %v2447_v57 = vld [vmem:[#allocation5 + $0xa4] ss:$24 sps:$4 sm:$0xff]  }
  0x6d   :  { %1105 = vmatprep.subr.bf16.mxu1 %v2370_v60  ;;  %v2480_v59 = vld [vmem:[#allocation5 + $0x3a4] ss:$24 sps:$4 sm:$0xff]   ;;  %v2445_v60 = vld [vmem:[#allocation5 + $0xa0] ss:$24 sps:$4 sm:$0xff]  }
  0x6f   :  { %1016 = vmatpush2.bf16.msra.mxu0 %v2371_v62  ;;  %v2478_v62 = vld [vmem:[#allocation5 + $0x3a0] ss:$24 sps:$4 sm:$0xff]  }
  0x70   :  { %1106 = vmatpush1.bf16.msra.mxu1 %v2368_v61  ;;  %1017 = vmatprep.subr.bf16.mxu0 %v2372_v63  ;;  %v2450_v61 = vld [vmem:[#allocation5 + $0x74] ss:$24 sps:$4 sm:$0xff]  }
  0x71   :  { %1107 = vmatprep.subr.bf16.mxu1 %v2376_v1  ;;  %v2486_v63 = vld [vmem:[#allocation5 + $0x374] ss:$24 sps:$4 sm:$0xff]   ;;  %v2448_v1 = vld [vmem:[#allocation5 + $0x70] ss:$24 sps:$4 sm:$0xff]  }
  0x73   :  { %1018 = vmatpush2.bf16.msra.mxu0 %v2377_v3  ;;  %v2484_v3 = vld [vmem:[#allocation5 + $0x370] ss:$24 sps:$4 sm:$0xff]  }
  0x74   :  { %1108 = vmatpush1.bf16.msra.mxu1 %v2374_v2  ;;  %1146 = vmatprep.subr.bf16.mxu0 %v2386_v6  ;;  %v2453_v2 = vld [vmem:[#allocation5 + $0x44] ss:$24 sps:$4 sm:$0xff]   ;;  %v2451_v6 = vld [vmem:[#allocation5 + $0x40] ss:$24 sps:$4 sm:$0xff]  }
  0x75   :  { %1109 = vmatprep.subr.bf16.mxu1 %v2383_v5  ;;  %v2492_v5 = vld [vmem:[#allocation5 + $0x344] ss:$24 sps:$4 sm:$0xff]  }
  0x76   :  { %1020 = vmatmul.mubr.bf16.vlgmr.msra.gmra.mxu0 %v2754_v7 }
  0x77   :  { %1147 = vmatpush1.bf16.msra.mxu0 %v2384_v9  ;;  %1029 = vmatprep.mubr.bf16.mxu0 %v2757_v12  ;;  %v2498_v9 = vld [vmem:[#allocation5 + $0x314] ss:$24 sps:$4 sm:$0xff]  }
  0x78   :  { %1110 = vmatpush2.bf16.msra.mxu1 %v2381_v8  ;;  %1148 = vmatprep.subr.bf16.mxu0 %v2392_v11  ;;  %v2459_v8 = vld [vmem:[#allocation5 + $0x14] ss:$24 sps:$4 sm:$0xff]   ;;  %v2465_v11 = vld [vmem:[#allocation5 + $0x2e4] ss:$24 sps:$4 sm:$0xff]  }
  0x79   :  { %1111 = vmatprep.subr.bf16.mxu1 %v2389_v10  ;;  %v2457_v10 = vld [vmem:[#allocation5 + $0x10] ss:$24 sps:$4 sm:$0xff]  }
  0x7b   :  { %1149 = vmatpush1.bf16.msra.mxu0 %v2390_v14  ;;  %v2463_v14 = vld [vmem:[#allocation5 + $0x2e0] ss:$24 sps:$4 sm:$0xff]  }
  0x7c   :  { %1112 = vmatpush2.bf16.msra.mxu1 %v2387_v13  ;;  %1150 = vmatprep.subr.bf16.mxu0 %v2398_v16  ;;  %v2496_v13 = vld [vmem:[#allocation5 + $0x310] ss:$24 sps:$4 sm:$0xff]  }
  0x7d   :  { %1113 = vmatprep.subr.bf16.mxu1 %v2395_v15  ;;  %v2471_v15 = vld [vmem:[#allocation5 + $0x2b4] ss:$24 sps:$4 sm:$0xff]   ;;  %v2469_v16 = vld [vmem:[#allocation5 + $0x2b0] ss:$24 sps:$4 sm:$0xff]  }
  0x7e   :  { %1030 = vmatmul.mubr.bf16.gmra.mxu0 %v2761_v17 }
  0x7f   :  { %1151 = vmatpush1.bf16.msra.mxu0 %v2396_v19  ;;  %1178 = vmatprep.mubr.bf16.mxu0 %v2687_v0  ;;  %v2475_v19 = vld [vmem:[#allocation5 + $0x280] ss:$24 sps:$4 sm:$0xff]  }
  0x80   :  { %1114 = vmatpush2.bf16.msra.mxu1 %v2393_v18  ;;  %1152 = vmatprep.subr.bf16.mxu0 %v2404_v21  ;;  %v2477_v18 = vld [vmem:[#allocation5 + $0x284] ss:$24 sps:$4 sm:$0xff]   ;;  %v2481_v21 = vld [vmem:[#allocation5 + $0x250] ss:$24 sps:$4 sm:$0xff]  }
  0x81   :  { %1115 = vmatprep.subr.bf16.mxu1 %v2401_v20  ;;  %v2483_v20 = vld [vmem:[#allocation5 + $0x254] ss:$24 sps:$4 sm:$0xff]  }
  0x83   :  { %1153 = vmatpush1.bf16.msra.mxu0 %v2402_v23  ;;  %v2487_v23 = vld [vmem:[#allocation5 + $0x220] ss:$24 sps:$4 sm:$0xff]  }
  0x84   :  { %1116 = vmatpush2.bf16.msra.mxu1 %v2399_v22  ;;  %1154 = vmatprep.subr.bf16.mxu0 %v2410_v25  ;;  %v2489_v22 = vld [vmem:[#allocation5 + $0x224] ss:$24 sps:$4 sm:$0xff]   ;;  %v2493_v25 = vld [vmem:[#allocation5 + $0x1f0] ss:$24 sps:$4 sm:$0xff]  }
  0x85   :  { %1117 = vmatprep.subr.bf16.mxu1 %v2407_v24  ;;  %v2495_v24 = vld [vmem:[#allocation5 + $0x1f4] ss:$24 sps:$4 sm:$0xff]  }
  0x87   :  { %1155 = vmatpush1.bf16.msra.mxu0 %v2408_v27  ;;  %v2502_v27 = vld [vmem:[#allocation5 + $0x190] ss:$24 sps:$4 sm:$0xff]  }
  0x88   :  { %1118 = vmatpush2.bf16.msra.mxu1 %v2405_v26  ;;  %1156 = vmatprep.subr.bf16.mxu0 %v2420_v29  ;;  %v2504_v26 = vld [vmem:[#allocation5 + $0x194] ss:$24 sps:$4 sm:$0xff]  }
  0x89   :  { %1119 = vmatprep.subr.bf16.mxu1 %v2417_v28  ;;  %v2507_v28 = vld [vmem:[#allocation7 + $0xac] ss:$12 sps:$4 sm:$0xff]   ;;  %v2510_v29 = vld [vmem:[#allocation7 + $0x94] ss:$12 sps:$4 sm:$0xff]  }
  0x8b   :  { %1157 = vmatpush1.bf16.msra.mxu0 %v2418_v31  ;;  %v2513_v31 = vld [vmem:[#allocation7 + $0x7c] ss:$12 sps:$4 sm:$0xff]  }
  0x8c   :  { %1120 = vmatpush2.bf16.msra.mxu1 %v2415_v30  ;;  %1158 = vmatprep.subr.bf16.mxu0 %v2426_v33  ;;  %v2508_v30 = vld [vmem:[#allocation7 + $0x90] ss:$12 sps:$4 sm:$0xff]  }
  0x8d   :  { %1121 = vmatprep.subr.bf16.mxu1 %v2423_v32  ;;  %v2532_v32 = vld [vmem:[#allocation7 + $0x170] ss:$12 sps:$4 sm:$0xff]  }
  0x8e   :  { %v2533_v33 = vld [vmem:[#allocation7 + $0xb0] ss:$12 sps:$4 sm:$0xff]  }
  0x8f   :  { %1159 = vmatpush1.bf16.msra.mxu0 %v2424_v36  ;;  %v2516_v36 = vld [vmem:[#allocation7 + $0x64] ss:$12 sps:$4 sm:$0xff]  }
  0x90   :  { %1122 = vmatpush2.bf16.msra.mxu1 %v2421_v34  ;;  %1160 = vmatprep.subr.bf16.mxu0 %v2432_v38  ;;  %v2511_v34 = vld [vmem:[#allocation7 + $0x78] ss:$12 sps:$4 sm:$0xff]   ;;  %v2522_v38 = vld [vmem:[#allocation7 + $0x34] ss:$12 sps:$4 sm:$0xff]  }
  0x91   :  { %1123 = vmatprep.subr.bf16.mxu1 %v2429_v37  ;;  %v2517_v37 = vld [vmem:[#allocation7 + $0x48] ss:$12 sps:$4 sm:$0xff]  }
  0x93   :  { %1161 = vmatpush1.bf16.msra.mxu0 %v2430_v40  ;;  %v2542_v40 = vld [vmem:[#allocation7 + $0x140] ss:$12 sps:$4 sm:$0xff]  }
  0x94   :  { %1124 = vmatpush2.bf16.msra.mxu1 %v2427_v39  ;;  %1199 = vmatprep.subr.bf16.mxu0 %v2435_v41  ;;  %v2538_v39 = vld [vmem:[#allocation7 + $0x98] ss:$12 sps:$4 sm:$0xff]   ;;  %v2520_v41 = vld [vmem:[#allocation7 + $0x30] ss:$12 sps:$4 sm:$0xff]  }
  0x95   :  { %1252 = vmatprep.subr.bf16.mxu1 %v2456_v42  ;;  %v2525_v42 = vld [vmem:[#allocation7 + $0x1c] ss:$12 sps:$4 sm:$0xff]  }
  0x96   :  { %1179 = vmatmul.mubr.bf16.vlgmr.msra.gmra.mxu0 %v2744_v35 }
  0x97   :  { %1126 = vmatmul.mubr.bf16.vlgmr.msra.gmra.mxu1 %v2754_v7  ;;  %1200 = vmatpush1.bf16.msra.mxu0 %v2433_v43  ;;  %v2523_v43 = vld [vmem:[#allocation7 + $0x18] ss:$12 sps:$4 sm:$0xff]  }
  0x98   :  { %1135 = vmatprep.mubr.bf16.mxu1 %v2757_v12  ;;  %1201 = vmatprep.subr.bf16.mxu0 %v2438_v44  ;;  %v2528_v44 = vld [vmem:[#allocation7 + $0x4] ss:$12 sps:$4 sm:$0xff]  }
  0x99   :  { %1188 = vmatprep.mubr.bf16.mxu0 %v2687_v0  ;;  %1253 = vmatpush1.bf16.msra.mxu1 %v2454_v46  ;;  %v2531_v46 = vld [vmem:[#allocation7 + $0x16c] ss:$12 sps:$4 sm:$0xff]  }
  0x9a   :  { %1254 = vmatprep.subr.bf16.mxu1 %v2462_v47  ;;  %v2529_v47 = vld [vmem:[#allocation7 + $0x168] ss:$12 sps:$4 sm:$0xff]  }
  0x9b   :  { %1202 = vmatpush1.bf16.msra.mxu0 %v2436_v45  ;;  %v2526_v45 = vld [vmem:[#allocation7] ss:$12 sps:$4 sm:$0xff]  }
  0x9c   :  { %1203 = vmatprep.subr.bf16.mxu0 %v2441_v48  ;;  %v2536_v48 = vld [vmem:[#allocation7 + $0x154] ss:$12 sps:$4 sm:$0xff]  }
  0x9d   :  { %1255 = vmatpush1.bf16.msra.mxu1 %v2460_v49  ;;  %v2534_v49 = vld [vmem:[#allocation7 + $0x150] ss:$12 sps:$4 sm:$0xff]  }
  0x9e   :  { %1189 = vmatmul.mubr.bf16.gmra.mxu0 %v2751_v4  ;;  %1256 = vmatprep.subr.bf16.mxu1 %v2468_v52  ;;  %v2539_v52 = vld [vmem:[#allocation7 + $0x138] ss:$12 sps:$4 sm:$0xff]  }
  0x9f   :  { %1136 = vmatmul.mubr.bf16.gmra.mxu1 %v2761_v17  ;;  %1204 = vmatpush1.bf16.msra.mxu0 %v2439_v50  ;;  %v2541_v50 = vld [vmem:[#allocation7 + $0x13c] ss:$12 sps:$4 sm:$0xff]  }
  0xa0   :  { %1205 = vmatprep.subr.bf16.mxu0 %v2444_v53  ;;  %1284 = vmatprep.mubr.bf16.mxu1 %v2687_v0  ;;  %v2543_v53 = vld [vmem:[#allocation7 + $0x80] ss:$12 sps:$4 sm:$0xff]  }
  0xa1   :  { %1257 = vmatpush1.bf16.msra.mxu1 %v2466_v54  ;;  %1231 = vmatprep.mubr.bf16.mxu0 %v2748_v51  ;;  %v2490_v51 = vld [vmem:[#allocation5 + $0x340] ss:$24 sps:$4 sm:$0xff]   ;;  %v2546_v54 = vld [vmem:[#allocation7 + $0x124] ss:$12 sps:$4 sm:$0xff]  }
  0xa2   :  { %1258 = vmatprep.subr.bf16.mxu1 %v2474_v55  ;;  %v2547_v55 = vld [vmem:[#allocation7 + $0x128] ss:$12 sps:$4 sm:$0xff]  }
  0xa3   :  { %1206 = vmatpush1.bf16.msra.mxu0 %v2442_v56  ;;  %v2544_v56 = vld [vmem:[#allocation7 + $0x120] ss:$12 sps:$4 sm:$0xff]  }
  0xa4   :  { %1207 = vmatprep.subr.bf16.mxu0 %v2447_v57  ;;  %v2548_v57 = vld [vmem:[#allocation7 + $0x68] ss:$12 sps:$4 sm:$0xff]  }
  0xa5   :  { %1259 = vmatpush1.bf16.msra.mxu1 %v2472_v58  ;;  %v2551_v58 = vld [vmem:[#allocation7 + $0x10c] ss:$12 sps:$4 sm:$0xff]  }
  0xa6   :  { %1260 = vmatprep.subr.bf16.mxu1 %v2480_v59  ;;  %v2552_v59 = vld [vmem:[#allocation7 + $0x110] ss:$12 sps:$4 sm:$0xff]  }
  0xa7   :  { %1208 = vmatpush1.bf16.msra.mxu0 %v2445_v60  ;;  %v2549_v60 = vld [vmem:[#allocation7 + $0x108] ss:$12 sps:$4 sm:$0xff]  }
  0xa8   :  { %1209 = vmatprep.subr.bf16.mxu0 %v2450_v61  ;;  %v2553_v61 = vld [vmem:[#allocation7 + $0x50] ss:$12 sps:$4 sm:$0xff]  }
  0xa9   :  { %1261 = vmatpush1.bf16.msra.mxu1 %v2478_v62  ;;  %v2556_v62 = vld [vmem:[#allocation7 + $0xf4] ss:$12 sps:$4 sm:$0xff]  }
  0xaa   :  { %1262 = vmatprep.subr.bf16.mxu1 %v2486_v63  ;;  %v2557_v63 = vld [vmem:[#allocation7 + $0xf8] ss:$12 sps:$4 sm:$0xff]  }
  0xab   :  { %1210 = vmatpush1.bf16.msra.mxu0 %v2448_v1  ;;  %v2554_v1 = vld [vmem:[#allocation7 + $0xf0] ss:$12 sps:$4 sm:$0xff]  }
  0xac   :  { %1211 = vmatprep.subr.bf16.mxu0 %v2453_v2  ;;  %v2558_v2 = vld [vmem:[#allocation7 + $0x38] ss:$12 sps:$4 sm:$0xff]  }
  0xad   :  { %1263 = vmatpush1.bf16.msra.mxu1 %v2484_v3  ;;  %v2561_v3 = vld [vmem:[#allocation7 + $0xdc] ss:$12 sps:$4 sm:$0xff]  }
  0xae   :  { %1264 = vmatprep.subr.bf16.mxu1 %v2492_v5  ;;  %v2562_v5 = vld [vmem:[#allocation7 + $0xe0] ss:$12 sps:$4 sm:$0xff]  }
  0xaf   :  { %1212 = vmatpush1.bf16.msra.mxu0 %v2451_v6  ;;  %v2559_v6 = vld [vmem:[#allocation7 + $0xd8] ss:$12 sps:$4 sm:$0xff]  }
  0xb0   :  { %1213 = vmatprep.subr.bf16.mxu0 %v2459_v8  ;;  %v2563_v8 = vld [vmem:[#allocation7 + $0x20] ss:$12 sps:$4 sm:$0xff]  }
  0xb1   :  { %1265 = vmatpush1.bf16.msra.mxu1 %v2490_v51  ;;  %v2566_v51 = vld [vmem:[#allocation7 + $0xc4] ss:$12 sps:$4 sm:$0xff]  }
  0xb2   :  { %1266 = vmatprep.subr.bf16.mxu1 %v2498_v9  ;;  %v2567_v9 = vld [vmem:[#allocation7 + $0xc8] ss:$12 sps:$4 sm:$0xff]  }
  0xb3   :  { %1214 = vmatpush1.bf16.msra.mxu0 %v2457_v10  ;;  %v2564_v10 = vld [vmem:[#allocation7 + $0xc0] ss:$12 sps:$4 sm:$0xff]  }
  0xb4   :  { %1215 = vmatprep.subr.bf16.mxu0 %v2465_v11  ;;  %v2568_v11 = vld [vmem:[#allocation7 + $0x8] ss:$12 sps:$4 sm:$0xff]  }
  0xb5   :  { %1267 = vmatpush1.bf16.msra.mxu1 %v2496_v13 }
  0xb6   :  { %1709 = vmatprep.subr.bf16.mxu1 %v2507_v28 }
  0xb7   :  { %1216 = vmatpush2.bf16.msra.mxu0 %v2463_v14 }
  0xb8   :  { %1217 = vmatprep.subr.bf16.mxu0 %v2471_v15  ;;  %1285 = vmatmul.mubr.bf16.vlgmr.msra.gmra.mxu1 %v2744_v35  ;;  %v2501_v35 = vld [vmem:[#allocation5 + $0x1c4] ss:$24 sps:$4 sm:$0xff]  }
  0xb9   :  { %1294 = vmatprep.mubr.bf16.mxu1 %v2687_v0  ;;  %v2499_v0 = vld [vmem:[#allocation5 + $0x1c0] ss:$24 sps:$4 sm:$0xff]  }
  0xbb   :  { %1218 = vmatpush2.bf16.msra.mxu0 %v2469_v16 }
  0xbc   :  { %1219 = vmatprep.subr.bf16.mxu0 %v2477_v18 }
  0xbf   :  { %1220 = vmatpush2.bf16.msra.mxu0 %v2475_v19 }
  0xc0   :  { %1221 = vmatprep.subr.bf16.mxu0 %v2483_v20  ;;  %1295 = vmatmul.mubr.bf16.gmra.mxu1 %v2751_v4  ;;  %v2505_v4 = vld [vmem:[#allocation7 + $0xa8] ss:$12 sps:$4 sm:$0xff]  }
  0xc1   :  { %1710 = vmatpush1.bf16.msra.mxu1 %v2505_v4 }
  0xc2   :  { %1711 = vmatprep.subr.bf16.mxu1 %v2510_v29 }
  0xc3   :  { %1222 = vmatpush2.bf16.msra.mxu0 %v2481_v21 }
  0xc4   :  { %1223 = vmatprep.subr.bf16.mxu0 %v2489_v22 }
  0xc5   :  { %1712 = vmatpush1.bf16.msra.mxu1 %v2508_v30 }
  0xc6   :  { %1713 = vmatprep.subr.bf16.mxu1 %v2513_v31 }
  0xc7   :  { %1224 = vmatpush2.bf16.msra.mxu0 %v2487_v23 }
  0xc8   :  { %1225 = vmatprep.subr.bf16.mxu0 %v2495_v24 }
  0xc9   :  { %1714 = vmatpush1.bf16.msra.mxu1 %v2511_v34 }
  0xca   :  { %1715 = vmatprep.subr.bf16.mxu1 %v2516_v36 }
  0xcb   :  { %1226 = vmatpush2.bf16.msra.mxu0 %v2493_v25 }
  0xcc   :  { %1227 = vmatprep.subr.bf16.mxu0 %v2501_v35 }
  0xcf   :  { %1228 = vmatpush2.bf16.msra.mxu0 %v2499_v0 }
  0xd0   :  { %1229 = vmatprep.subr.bf16.mxu0 %v2504_v26 }
  0xd3   :  { %1230 = vmatpush2.bf16.msra.mxu0 %v2502_v27 }
  0xd4   :  { %2187 = vmatprep.subr.bf16.mxu0 %v2532_v32 }
  0xd6   :  { %1232 = vmatmul.mubr.bf16.vlgmr.msra.gmra.mxu0 %v2754_v7  ;;  %v2514_v7 = vld [vmem:[#allocation7 + $0x60] ss:$12 sps:$4 sm:$0xff]  }
  0xd7   :  { %1241 = vmatprep.mubr.bf16.mxu0 %v2757_v12  ;;  %2188 = vmatpush3.bf16.msra.mxu0 %v2533_v33  ;;  %v2519_v12 = vld [vmem:[#allocation7 + $0x4c] ss:$12 sps:$4 sm:$0xff]  }
  0xd8   :  { %1716 = vmatpush1.bf16.msra.mxu1 %v2514_v7 }
  0xd9   :  { %1717 = vmatprep.subr.bf16.mxu1 %v2519_v12 }
  0xdc   :  { %1718 = vmatpush1.bf16.msra.mxu1 %v2517_v37  ;;  %v1307_v37 = vlaneseq }
  0xdd   :  { %1719 = vmatprep.subr.bf16.mxu1 %v2522_v38 }
  0xde   :  { %1242 = vmatmul.mubr.bf16.gmra.mxu0 %v2761_v17  ;;  %v2537_v17 = vld [vmem:[#allocation7 + $0x158] ss:$12 sps:$4 sm:$0xff]  }
  0xdf   :  { %2189 = vmatprep.subr.bf16.mxu0 %v2537_v17 }
  0xe0   :  { %2190 = vmatpush3.bf16.msra.mxu0 %v2538_v39  ;;  %1720 = vmatpush1.bf16.msra.mxu1 %v2520_v41 }
  0xe1   :  { %2191 = vmatprep.subr.bf16.mxu0 %v2542_v40  ;;  %1721 = vmatprep.subr.bf16.mxu1 %v2525_v42  ;;  %v2783_v40 = vshrl.u32 %v1307_v37, 7 }
  0xe3   :  { %vm1335_vm0 = vcmp.lt.s32.totalorder %v2783_v40, 7  ;;  %vm1360_vm1 = vcmp.lt.s32.totalorder %v2783_v40, 6 }
  0xe4   :  { %1722 = vmatpush1.bf16.msra.mxu1 %v2523_v43  ;;  %2192 = vmatpush3.bf16.msra.mxu0 %v2543_v53  ;;  %v1309_v43 = vsub.s32 0, %v2783_v40 }
  0xe5   :  { %1723 = vmatprep.subr.bf16.mxu1 %v2528_v44  ;;  %2193 = vmatprep.subr.bf16.mxu0 %v2547_v55  ;;  %v1313_v44 = vsub.s32 1, %v2783_v40 }
  0xe8   :  { %1724 = vmatpush1.bf16.msra.mxu1 %v2526_v45  ;;  %2194 = vmatpush3.bf16.msra.mxu0 %v2548_v57 }
  0xe9   :  { %1725 = vmatprep.subr.bf16.mxu1 %v2531_v46  ;;  %2195 = vmatprep.subr.bf16.mxu0 %v2552_v59 }
  0xec   :  { %1726 = vmatpush2.bf16.msra.mxu1 %v2529_v47  ;;  %2196 = vmatpush3.bf16.msra.mxu0 %v2553_v61  ;;  %v1305_v47 = vld [vmem:[%s2871_s2] sm:$0x3] }
  0xed   :  { %1727 = vmatprep.subr.bf16.mxu1 %v2536_v48  ;;  %2197 = vmatprep.subr.bf16.mxu0 %v2557_v63 }
  0xf0   :  { %1728 = vmatpush2.bf16.msra.mxu1 %v2534_v49  ;;  %2198 = vmatpush3.bf16.msra.mxu0 %v2558_v2  ;;  %v2790_v49 = vrot.slane %v1305_v47, %v1309_v43 }
  0xf1   :  { %1729 = vmatprep.subr.bf16.mxu1 %v2541_v50  ;;  %2199 = vmatprep.subr.bf16.mxu0 %v2562_v5 }
  0xf4   :  { %1730 = vmatpush2.bf16.msra.mxu1 %v2539_v52  ;;  %2200 = vmatpush3.bf16.msra.mxu0 %v2563_v8  ;;  %v1314_v52 = vrot.slane %v1305_v47, %v1313_v44 }
  0xf5   :  { %1731 = vmatprep.subr.bf16.mxu1 %v2546_v54  ;;  %2201 = vmatprep.subr.bf16.mxu0 %v2567_v9 }
  0xf8   :  { %1732 = vmatpush2.bf16.msra.mxu1 %v2544_v56  ;;  %2202 = vmatpush3.bf16.msra.mxu0 %v2568_v11 }
  0xf9   :  { %1733 = vmatprep.subr.bf16.mxu1 %v2551_v58 }
  0xfc   :  { %1734 = vmatpush2.bf16.msra.mxu1 %v2549_v60 }
  0xfd   :  { %1735 = vmatprep.subr.bf16.mxu1 %v2556_v62 }
 0x100   :  { %1736 = vmatpush2.bf16.msra.mxu1 %v2554_v1 }
 0x101   :  { %1737 = vmatprep.subr.bf16.mxu1 %v2561_v3 }
 0x104   :  { %1738 = vmatpush2.bf16.msra.mxu1 %v2559_v6 }
 0x105   :  { %1739 = vmatprep.subr.bf16.mxu1 %v2566_v51 }
 0x108   :  { %1740 = vmatpush2.bf16.msra.mxu1 %v2564_v10 }
 0x117   :  { %v1074_v13 = vpop.f32.mrf.mxu1 }
 0x119   :  { %v1076_v14 = vpop.f32.mrf.mxu1 }
 0x11b   :  { %v1078_v15 = vpop.f32.mrf.mxu1 }
 0x11d   :  { %v1080_v16 = vpop.f32.mrf.mxu1 }
 0x11f   :  { %v1084_v19 = vpop.f32.mrf.mxu1 }
 0x121   :  { %v1086_v21 = vpop.f32.mrf.mxu1 }
 0x123   :  { %v2779_v23 = vpop.f32.mrf.mxu1 }
 0x125   :  { %v1090_v25 = vpop.f32.mrf.mxu1 }
 0x136   :  { %v1021_v18 = vpop.f32.mrf.mxu0 }
 0x137   :  { %v1075_v48 = vadd.f32 %v1074_v13, %v1021_v18 }
 0x138   :  { %v1023_v20 = vpop.f32.mrf.mxu0 }
 0x139   :  { %v1077_v50 = vadd.f32 %v1076_v14, %v1023_v20  ;;  %v1317_v63 = vadd.f32 %v2790_v49, %v1075_v48 }
 0x13a   :  { %v1025_v22 = vpop.f32.mrf.mxu0 }
 0x13b   :  { %v1079_v55 = vadd.f32 %v1078_v15, %v1025_v22  ;;  %v1318_v1 = vadd.f32 %v1314_v52, %v1077_v50 }
 0x13c   :  { %v1027_v24 = vpop.f32.mrf.mxu0 }
 0x13d   :  { %v1081_v57 = vadd.f32 %v1080_v16, %v1027_v24  ;;  %v1319_v6 = vadd.f32 %v2790_v49, %v1079_v55 }
 0x13e   :  { %v1031_v35 = vpop.f32.mrf.mxu0 }
 0x13f   :  { %v1085_v8 = vadd.f32 %v1084_v19, %v1031_v35  ;;  %v1320_v10 = vadd.f32 %v1314_v52, %v1081_v57 }
 0x140   :  { %v1033_v26 = vpop.f32.mrf.mxu0 }
 0x141   :  { %v1087_v51 = vadd.f32 %v1086_v21, %v1033_v26  ;;  %v1321_v21 = vadd.f32 %v2790_v49, %v1085_v8 }
 0x142   :  { %v2781_v4 = vpop.f32.mrf.mxu0 }
 0x143   :  { %v1322_v35 = vadd.f32 %v1314_v52, %v1087_v51  ;;  %v1089_v37 = vadd.f32 %v2779_v23, %v2781_v4 }
 0x144   :  { %v1037_v29 = vpop.f32.mrf.mxu0 }
 0x145   :  { %v1091_v24 = vadd.f32 %v1090_v25, %v1037_v29 }
 0x156   :  { %v1180_v31 = vpop.f32.mrf.mxu0 }
 0x157   :  { %v1127_v0 = vpop.f32.mrf.mxu1 }
 0x158   :  { %v1182_v33 = vpop.f32.mrf.mxu0  ;;  %v2795_v62 = vadd.f32 %v1180_v31, %v1127_v0 }
 0x159   :  { %v1129_v27 = vpop.f32.mrf.mxu1 }
 0x15a   :  { %v1184_v36 = vpop.f32.mrf.mxu0  ;;  %v1183_v2 = vadd.f32 %v1182_v33, %v1129_v27  ;;  %v1325_v16 = vrot.slane %v2795_v62, 1 }
 0x15b   :  { %v1131_v28 = vpop.f32.mrf.mxu1 }
 0x15c   :  { %v1186_v12 = vpop.f32.mrf.mxu0  ;;  %v1185_v56 = vadd.f32 %v1184_v36, %v1131_v28  ;;  %v1326_v0 = vrot.slane %v1183_v2, 1 }
 0x15d   :  { %v1133_v30 = vpop.f32.mrf.mxu1 }
 0x15e   :  { %v1190_v38 = vpop.f32.mrf.mxu0  ;;  %v1187_v58 = vadd.f32 %v1186_v12, %v1133_v30  ;;  %v1327_v9 = vrot.slane %v1185_v56, 1 }
 0x15f   :  { %v1137_v32 = vpop.f32.mrf.mxu1 }
 0x160   :  { %v1192_v41 = vpop.f32.mrf.mxu0  ;;  %v1191_v59 = vadd.f32 %v1190_v38, %v1137_v32  ;;  %v1328_v11 = vrot.slane %v1187_v58, 1  ;;  %v1340_v26 = vsel %vm1335_vm0, %v1325_v16, %v1327_v9  ;;  %v1324_v38 = vadd.f32 %v1314_v52, %v1091_v24 }
 0x161   :  { %v1139_v34 = vpop.f32.mrf.mxu1  ;;  %v1344_v44 = vadd.f32 %v1340_v26, %v1317_v63 }
 0x162   :  { %v1194_v45 = vpop.f32.mrf.mxu0  ;;  %v2792_v60 = vadd.f32 %v1192_v41, %v1139_v34  ;;  %v1329_v13 = vrot.slane %v1191_v59, 1  ;;  %v1341_v32 = vsel %vm1335_vm0, %v1326_v0, %v1328_v11 }
 0x163   :  { %v1141_v7 = vpop.f32.mrf.mxu1  ;;  %v1345_v48 = vadd.f32 %v1341_v32, %v1318_v1 }
 0x164   :  { %v1196_v53 = vpop.f32.mrf.mxu0  ;;  %v1330_v14 = vrot.slane %v2792_v60, 1  ;;  %v1195_v18 = vadd.f32 %v1194_v45, %v1141_v7  ;;  %v1338_v33 = vsel %vm1335_vm0, %v1327_v9, %v1329_v13 }
 0x165   :  { %v1143_v17 = vpop.f32.mrf.mxu1  ;;  %v1346_v50 = vadd.f32 %v1338_v33, %v1319_v6 }
 0x166   :  { %v1197_v27 = vadd.f32 %v1196_v53, %v1143_v17  ;;  %v1339_v25 = vsel %vm1335_vm0, %v1328_v11, %v1330_v14  ;;  %v1331_v36 = vrot.slane %v1195_v18, 1 }
 0x167   :  { %v1347_v53 = vadd.f32 %v1339_v25, %v1320_v10 }
 0x168   :  { %v1336_v23 = vsel %vm1335_vm0, %v1329_v13, %v1331_v36  ;;  %v1342_v6 = vsel %vm1335_vm0, %v1331_v36, %v1325_v16  ;;  %v1885_v36 = vld [vmem:[#allocation8 + $0x70] sm:$0xff] }
 0x169   :  { %v1348_v8 = vadd.f32 %v1336_v23, %v1321_v21 }
 0x178   :  { %v1286_v39 = vpop.f32.mrf.mxu1 }
 0x17a   :  { %v1288_v42 = vpop.f32.mrf.mxu1 }
 0x17c   :  { %v1290_v46 = vpop.f32.mrf.mxu1 }
 0x17e   :  { %v1292_v54 = vpop.f32.mrf.mxu1 }
 0x180   :  { %v1296_v5 = vpop.f32.mrf.mxu1 }
 0x182   :  { %v1298_v30 = vpop.f32.mrf.mxu1 }
 0x196   :  { %v1233_v61 = vpop.f32.mrf.mxu0 }
 0x197   :  { %v1287_v28 = vadd.f32 %v1286_v39, %v1233_v61  ;;  %v1332_v39 = vrot.slane %v1197_v27, 1 }
 0x198   :  { %v1235_v3 = vpop.f32.mrf.mxu0 }
 0x199   :  { %v2802_v20 = vadd.f32 %v1288_v42, %v1235_v3  ;;  %v1352_v41 = vrot.slane %v1287_v28, 2  ;;  %v1300_v42 = vpop.f32.mrf.mxu1  ;;  %v1337_v57 = vsel %vm1335_vm0, %v1330_v14, %v1332_v39  ;;  %v1343_v58 = vsel %vm1335_vm0, %v1332_v39, %v1326_v0  ;;  %v1879_v39 = vld [vmem:[#allocation8 + $0x40] sm:$0xff] }
 0x19a   :  { %v1237_v15 = vpop.f32.mrf.mxu0  ;;  %v1349_v9 = vadd.f32 %v1337_v57, %v1322_v35  ;;  %v1351_v10 = vadd.f32 %v1343_v58, %v1324_v38  ;;  %v1880_v38 = vld [vmem:[#allocation8 + $0x48] sm:$0xff] }
 0x19b   :  { %v1291_v22 = vadd.f32 %v1290_v46, %v1237_v15  ;;  %v1353_v7 = vrot.slane %v2802_v20, 2  ;;  %v1302_v60 = vpop.f32.mrf.mxu1 }
 0x19c   :  { %v1239_v19 = vpop.f32.mrf.mxu0 }
 0x19d   :  { %v1293_v31 = vadd.f32 %v1292_v54, %v1239_v19  ;;  %v1354_v29 = vrot.slane %v1291_v22, 2 }
 0x19e   :  { %v1243_v34 = vpop.f32.mrf.mxu0 }
 0x19f   :  { %v1355_v12 = vrot.slane %v1293_v31, 2  ;;  %v1297_v17 = vadd.f32 %v1296_v5, %v1243_v34  ;;  %v1365_v54 = vsel %vm1360_vm1, %v1352_v41, %v1354_v29  ;;  %v1323_v5 = vadd.f32 %v2790_v49, %v1089_v37  ;;  %v1886_v34 = vld [vmem:[#allocation8 + $0x78] sm:$0xff]  ;;  %v1881_v37 = vld [vmem:[#allocation8 + $0x50] sm:$0xff] }
 0x1a0   :  { %v1245_v43 = vpop.f32.mrf.mxu0  ;;  %v1369_v63 = vadd.f32 %v1365_v54, %v1344_v44  ;;  %v1875_v44 = vld [vmem:[#allocation8 + $0x20] sm:$0xff] }
 0x1a1   :  { %v1366_v45 = vsel %vm1360_vm1, %v1353_v7, %v1355_v12  ;;  %v1356_v46 = vrot.slane %v1297_v17, 2  ;;  %v1299_v47 = vadd.f32 %v1298_v30, %v1245_v43  ;;  %v1350_v22 = vadd.f32 %v1342_v6, %v1323_v5  ;;  %v1882_v17 = vld [vmem:[#allocation8 + $0x58] sm:$0xff]  ;;  %v1876_v43 = vld [vmem:[#allocation8 + $0x28] sm:$0xff] }
 0x1a2   :  { %v1247_v55 = vpop.f32.mrf.mxu0  ;;  %v1370_v62 = vadd.f32 %v1366_v45, %v1345_v48  ;;  %v1377_v24 = vmax.f32 %v1369_v63, 0.0  ;;  %v1874_v45 = vld [vmem:[#allocation8 + $0x18] sm:$0xff]  ;;  %v1871_v48 = vld [vmem:[#allocation8] sm:$0xff] }
 0x1a3   :  { %v1363_v4 = vsel %vm1360_vm1, %v1354_v29, %v1356_v46  ;;  %v1357_v52 = vrot.slane %v1299_v47, 2  ;;  %v1301_v56 = vadd.f32 %v1300_v42, %v1247_v55  ;;  %v2688_v29 = vmov 0.0   ;;  %v1877_v42 = vld [vmem:[#allocation8 + $0x30] sm:$0xff]  ;;  %v1872_v47 = vld [vmem:[#allocation8 + $0x8] sm:$0xff] }
 0x1a4   :  { %v1371_v59 = vadd.f32 %v1363_v4, %v1346_v50  ;;  %v1249_v61 = vpop.f32.mrf.mxu0  ;;  %v1378_v18 = vmax.f32 %v1370_v62, 0.0  ;;  %2232 = vmatprep.subr.mxu0 %v2688_v29 }
 0x1a5   :  { %v1364_v1 = vsel %vm1360_vm1, %v1355_v12, %v1357_v52  ;;  %v1358_v2 = vrot.slane %v1301_v56, 2  ;;  %v1303_v3 = vadd.f32 %v1302_v60, %v1249_v61  ;;  %v1883_v12 = vld [vmem:[#allocation8 + $0x60] sm:$0xff] }
 0x1a6   :  { %v1372_v51 = vadd.f32 %v1364_v1, %v1347_v53  ;;  %v1379_v11 = vmax.f32 %v1371_v59, 0.0 }
 0x1a7   :  { %v1359_v13 = vrot.slane %v1303_v3, 2  ;;  %v1361_v14 = vsel %vm1360_vm1, %v1356_v46, %v1358_v2  ;;  %v1367_v15 = vsel %vm1360_vm1, %v1358_v2, %v1352_v41  ;;  %v1878_v41 = vld [vmem:[#allocation8 + $0x38] sm:$0xff]  ;;  %v1873_v46 = vld [vmem:[#allocation8 + $0x10] sm:$0xff] }
 0x1a8   :  { %v1380_v20 = vmax.f32 %v1372_v51, 0.0  ;;  %v1385_v30 = vpack.c.bf16 %v1379_v11, %v1377_v24  ;;  %v1373_v19 = vadd.f32 %v1361_v14, %v1348_v8  ;;  %v1375_v21 = vadd.f32 %v1367_v15, %v1350_v22 }
 0x1a9   :  { %v1362_v49 = vsel %vm1360_vm1, %v1357_v52, %v1359_v13  ;;  %v1368_v16 = vsel %vm1360_vm1, %v1359_v13, %v1353_v7  ;;  %v1884_v7 = vld [vmem:[#allocation8 + $0x68] sm:$0xff]  ;;  %v2185_v52 = vld [vmem:[%s2873_s4] ss:$0 sm:$0xff]  ;;  %v1850_v22 = vadd.s32 8, %v2783_v40 }
 0x1aa   :  { %v1386_v0 = vpack.c.bf16 %v1380_v20, %v1378_v18  ;;  %v1374_v27 = vadd.f32 %v1362_v49, %v1349_v9  ;;  %v1376_v28 = vadd.f32 %v1368_v16, %v1351_v10  ;;  %v1381_v32 = vmax.f32 %v1373_v19, 0.0 }
 0x1ab   :  { %v1383_v33 = vmax.f32 %v1375_v21, 0.0  ;;  %vm1852_vm3 = vcmp.lt.s32.totalorder %v1850_v22, 12 }
 0x1ac   :  { %1741 = vmatprep.mubr.bf16.mxu1 %v1386_v0  ;;  %1794 = vmatprep.mubr.bf16.mxu0 %v1386_v0  ;;  %v1382_v35 = vmax.f32 %v1374_v27, 0.0  ;;  %v1384_v26 = vmax.f32 %v1376_v28, 0.0 }
 0x1ad   :  { %1742 = vmatmul.mubr.bf16.vlgmr.msra.gmra.mxu1 %v1385_v30  ;;  %1795 = vmatmul.mubr.bf16.vlgmr.msra.gmra.mxu0 %v1385_v30  ;;  %v1387_v25 = vpack.c.bf16 %v1383_v33, %v1381_v32 }
 0x1ae   :  { %v1388_v31 = vpack.c.bf16 %v1384_v26, %v1382_v35  ;;  %2233 = vmatpush3.msra.mxu0 %v1886_v34 }
 0x1af   :  { %2234 = vmatprep.subr.mxu0 %v2688_v29 }
 0x1b0   :  { %1751 = vmatprep.mubr.bf16.mxu1 %v1388_v31  ;;  %1802 = vmatprep.mubr.bf16.mxu0 %v1388_v31 }
 0x1b1   :  { %2235 = vmatpush3.msra.mxu0 %v1885_v36 }
 0x1b2   :  { %2236 = vmatprep.subr.mxu0 %v2688_v29 }
 0x1b3   :  { %2237 = vmatpush3.msra.mxu0 %v1884_v7 }
 0x1b4   :  { %2238 = vmatprep.subr.mxu0 %v2688_v29 }
 0x1b5   :  { %1752 = vmatmul.mubr.bf16.gmra.mxu1 %v1387_v25  ;;  %1803 = vmatmul.mubr.bf16.gmra.mxu0 %v1387_v25 }
 0x1b6   :  { %2239 = vmatpush3.msra.mxu0 %v1883_v12  ;;  %2264 = vmatprep.mubr.msk.f32.mxu0 %vm2689_vm2, %v2688_v29 }
 0x1b7   :  { %2240 = vmatprep.subr.mxu0 %v2688_v29 }
 0x1b8   :  { %2241 = vmatpush3.msra.mxu0 %v1882_v17 }
 0x1b9   :  { %2242 = vmatprep.subr.mxu0 %v2688_v29 }
 0x1ba   :  { %2243 = vmatpush3.msra.mxu0 %v1881_v37 }
 0x1bb   :  { %2244 = vmatprep.subr.mxu0 %v2688_v29 }
 0x1bc   :  { %2245 = vmatpush3.msra.mxu0 %v1880_v38 }
 0x1bd   :  { %2246 = vmatprep.subr.mxu0 %v2688_v29 }
 0x1be   :  { %2247 = vmatpush3.msra.mxu0 %v1879_v39 }
 0x1bf   :  { %2248 = vmatprep.subr.mxu0 %v2688_v29 }
 0x1c0   :  { %2249 = vmatpush3.msra.mxu0 %v1878_v41 }
 0x1c1   :  { %2250 = vmatprep.subr.mxu0 %v2688_v29 }
 0x1c2   :  { %2251 = vmatpush3.msra.mxu0 %v1877_v42 }
 0x1c3   :  { %2252 = vmatprep.subr.mxu0 %v2688_v29 }
 0x1c4   :  { %2253 = vmatpush3.msra.mxu0 %v1876_v43 }
 0x1c5   :  { %2254 = vmatprep.subr.mxu0 %v2688_v29 }
 0x1c6   :  { %2255 = vmatpush3.msra.mxu0 %v1875_v44 }
 0x1c7   :  { %2256 = vmatprep.subr.mxu0 %v2688_v29 }
 0x1c8   :  { %2257 = vmatpush3.msra.mxu0 %v1874_v45 }
 0x1c9   :  { %2258 = vmatprep.subr.mxu0 %v2688_v29 }
 0x1ca   :  { %2259 = vmatpush3.msra.mxu0 %v1873_v46 }
 0x1cb   :  { %2260 = vmatprep.subr.mxu0 %v2688_v29 }
 0x1cc   :  { %2261 = vmatpush3.msra.mxu0 %v1872_v47 }
 0x1cd   :  { %2262 = vmatprep.subr.mxu0 %v2688_v29 }
 0x1ce   :  { %2263 = vmatpush3.msra.mxu0 %v1871_v48 }
 0x26d   :  { %v1743_v50 = vpop.f32.mrf.mxu1  ;;  %v2203_v53 = vpop.f32.mrf.mxu0 }
 0x26e   :  { %v1818_v1 = vadd.f32 %v2185_v52, %v1743_v50 }
 0x26f   :  { %v1745_v54 = vpop.f32.mrf.mxu1  ;;  %v2204_v55 = vpop.f32.mrf.mxu0 }
 0x270   :  { %v2205_v56 = vadd.f32 %v2204_v55, %v2203_v53  ;;  %v1822_v59 = vrot.slane %v1745_v54, 1 }
 0x271   :  { %v1747_v23 = vpop.f32.mrf.mxu1  ;;  %v2206_v4 = vpop.f32.mrf.mxu0 }
 0x272   :  { %v1834_v5 = vrot.slane %v2205_v56, 2  ;;  %v1819_v11 = vadd.f32 %v2185_v52, %v1747_v23  ;;  %v2186_v56 = vld [vmem:[%s2875_s6] ss:$0 sm:$0xff] }
 0x273   :  { %v1749_v57 = vpop.f32.mrf.mxu1  ;;  %v2207_v58 = vpop.f32.mrf.mxu0 }
 0x274   :  { %v1823_v60 = vrot.slane %v1749_v57, 1  ;;  %v2208_v61 = vadd.f32 %v2207_v58, %v2206_v4 }
 0x275   :  { %v1753_v62 = vpop.f32.mrf.mxu1  ;;  %v2209_v63 = vpop.f32.mrf.mxu0 }
 0x276   :  { %v1828_v2 = vsel %vm1335_vm0, %v1822_v59, %v1823_v60  ;;  %v1835_v3 = vrot.slane %v2208_v61, 2  ;;  %v1820_v19 = vadd.f32 %v2185_v52, %v1753_v62 }
 0x277   :  { %v1755_v6 = vpop.f32.mrf.mxu1  ;;  %v2210_v8 = vpop.f32.mrf.mxu0  ;;  %v1830_v51 = vadd.f32 %v1828_v2, %v1818_v1 }
 0x278   :  { %v1824_v9 = vrot.slane %v1755_v6, 1  ;;  %v2211_v10 = vadd.f32 %v2210_v8, %v2209_v63  ;;  %v1840_v13 = vsel %vm1360_vm1, %v1834_v5, %v1835_v3 }
 0x279   :  { %v1757_v14 = vpop.f32.mrf.mxu1  ;;  %v2212_v15 = vpop.f32.mrf.mxu0  ;;  %v1842_v0 = vadd.f32 %v1840_v13, %v1830_v51 }
 0x27a   :  { %v1827_v18 = vsel %vm1335_vm0, %v1823_v60, %v1824_v9  ;;  %v1836_v20 = vrot.slane %v2211_v10, 2  ;;  %v1821_v35 = vadd.f32 %v2185_v52, %v1757_v14 }
 0x27b   :  { %v1831_v24 = vadd.f32 %v1827_v18, %v1819_v11  ;;  %v1759_v49 = vpop.f32.mrf.mxu1  ;;  %v2213_v16 = vpop.f32.mrf.mxu0  ;;  %v1846_v34 = vmax.f32 %v1842_v0, 0.0 }
 0x27c   :  { %v1839_v27 = vsel %vm1360_vm1, %v1835_v3, %v1836_v20  ;;  %v1825_v28 = vrot.slane %v1759_v49, 1  ;;  %v2214_v30 = vadd.f32 %v2213_v16, %v2212_v15 }
 0x27d   :  { %v1843_v21 = vadd.f32 %v1839_v27, %v1831_v24 }
 0x27e   :  { %v1826_v26 = vsel %vm1335_vm0, %v1824_v9, %v1825_v28  ;;  %v1829_v31 = vsel %vm1335_vm0, %v1825_v28, %v1822_v59  ;;  %v1837_v32 = vrot.slane %v2214_v30, 2 }
 0x27f   :  { %v1847_v33 = vmax.f32 %v1843_v21, 0.0  ;;  %v1832_v25 = vadd.f32 %v1826_v26, %v1820_v19  ;;  %v1833_v29 = vadd.f32 %v1829_v31, %v1821_v35 }
 0x280   :  { %v1838_v36 = vsel %vm1360_vm1, %v1836_v20, %v1837_v32  ;;  %v1841_v7 = vsel %vm1360_vm1, %v1837_v32, %v1834_v5 }
 0x281   :  { %v1854_v12 = vsel %vm1852_vm3, %v1847_v33, -inf  ;;  %v1844_v17 = vadd.f32 %v1838_v36, %v1832_v25  ;;  %v1845_v37 = vadd.f32 %v1841_v7, %v1833_v29 }
 0x282   :  { %v1857_v38 = vmax.f32 %v1846_v34, %v1854_v12 }
 0x283   :  { %v1848_v39 = vmax.f32 %v1844_v17, 0.0  ;;  %v1849_v41 = vmax.f32 %v1845_v37, 0.0 }
 0x284   :  { %v1858_v42 = vrot.slane %v1857_v38, 4 }
 0x285   :  { %v1856_v43 = vsel %vm1852_vm3, %v1849_v41, -inf }
 0x286   :  { %v1859_v44 = vmax.f32 %v1857_v38, %v1858_v42  ;;  %v1864_v45 = vmax.f32 %v1848_v39, %v1856_v43 }
 0x288   :  { %v1860_v46 = vrot.slane %v1859_v44, 2  ;;  %v1865_v47 = vrot.slane %v1864_v45, 4 }
 0x28a   :  { %v1866_v48 = vmax.f32 %v1864_v45, %v1865_v47  ;;  %v1861_v50 = vmax.f32 %v1859_v44, %v1860_v46 }
 0x28c   :  { %v1867_v53 = vrot.slane %v1866_v48, 2  ;;  %v1862_v54 = vrot.slane %v1861_v50, 1 }
 0x28e   :  { %v1868_v40 = vmax.f32 %v1866_v48, %v1867_v53  ;;  %v1863_v23 = vmax.f32 %v1861_v50, %v1862_v54 }
 0x290   :  { %v1869_v55 = vrot.slane %v1868_v40, 1 }
 0x292   :  { %v1870_v4 = vmax.f32 %v1868_v40, %v1869_v55 }
 0x294   :  { %v1897_v52 = vsel %vm1896_vm4, %v1870_v4, %v1863_v23 }
 0x295   :  { %2265 = vmatmul.mubr.f32.vlgmr.msra.gmra.mxu0 %v1897_v52 }
 0x355   :  { %v1965_v57 = vpop.f32.mrf.mxu0 }
 0x356   :  { %v1966_v58 = vadd.f32 %v2186_v56, %v1965_v57 }
 0x357   :  { %v2266_v59 = vpop.f32.mrf.mxu0 }
 0x358   :  { %1969 = vst [vmem:[#allocation10] sm:$0x3] %v1966_v58 }
 0x359   :  { %2660 = shalt.err (!%p2657_p10)
}
 0x35a   :  { %1979 = dma.vmem_to_hbm [thread:$0]  %s1977_s28, 32, %s2876_s7, [#allocation4]  }
 0x35b   :  { %2675 = dma.done.wait [#allocation4], 32  }
 0x35c   :  { %2676 = vsyncadd [#allocation4], 4294967264 }
 0x35d   :  { %1983 = vsyncpa [#allocation3], 1 }
 0x35e   :  { %1984 = vsyncpa [#allocation6], 1 }
 0x35f   :  { %1985 = vsyncpa [#allocation9], 1 }
 0x360   :  { %1986 = vsyncpa [#allocation4], 1 }

</bundles_post_ra>
